<compile_context>
chip_gen: v5e
topology: v5e:2x2
jax: 0.10.0
libtpu: 0.0.40
codegen_flags: <defaults>
</compile_context>

<pallas_src>
import jax
import jax.numpy as jnp
from jax.experimental import pallas as pl
from jax.experimental.pallas import tpu as pltpu

# Use high-precision f32 matmuls everywhere so the kernel and the pure-JAX
# reference agree tightly (also makes the greedy token choice deterministic).
jax.config.update("jax_default_matmul_precision", "highest")

MAX_LENGTH = 10          # attention span and number of fused decode steps
HIDDEN = 32              # hidden_size
OUTPUT_SIZE = 20         # output_size (vocab)
B_TILE = 8               # decode streams per grid step (one sublane tile)


def _round_up(x, m):
    return (x + m - 1) // m * m


# ---------------- packed parameter slab layout (rows x 128 lanes, f32) ----------------
EMB_ROWS = _round_up(OUTPUT_SIZE, 8)            # 24
EMB_OFF    = 0                                  # (EMB_ROWS, H) embedding table
ATTN_E_OFF = EMB_OFF + EMB_ROWS                 # (H, L)  attn linear, emb rows
ATTN_H_OFF = ATTN_E_OFF + HIDDEN                # (H, L)  attn linear, hidden rows
COMB_E_OFF = ATTN_H_OFF + HIDDEN                # (H, H)  attn_combine, emb rows
COMB_A_OFF = COMB_E_OFF + HIDDEN                # (H, H)  attn_combine, applied rows
GX_OFF     = COMB_A_OFF + HIDDEN                # (H, 3H) GRU x part   [r|z|n]
GH_OFF     = GX_OFF + HIDDEN                    # (H, 3H) GRU hid part [r|z|0]
HHN_OFF    = GH_OFF + HIDDEN                    # (H, H)  GRU hid part of n gate
OUT_OFF    = HHN_OFF + HIDDEN                   # (H, O)  output linear
BIAS_OFF   = OUT_OFF + HIDDEN                   # 5 bias rows (padded to 8)
SLAB_ROWS  = BIAS_OFF + 8                       # 288
SLAB_W     = 128                                # single lane tile

PACK_W = 128                                    # lane-dense packed output row
TOK_COL = OUTPUT_SIZE + HIDDEN + MAX_LENGTH     # 62: column holding the greedy token id


def attn_decoder_decode_kernel(onehot0_ref, hid0_ref, enc_ref, slab_ref, out_ref,
                               oh_ref, hid_ref):
    H, L, O = HIDDEN, MAX_LENGTH, OUTPUT_SIZE
    t = pl.program_id(1)

    # Step 0 of each batch block: load the initial carries into VMEM scratch.
    @pl.when(t == 0)
    def _():
        oh_ref[...] = onehot0_ref[...]
        hid_ref[...] = hid0_ref[...]

    onehot = oh_ref[...]                                   # (B, EMB_ROWS)
    hid = hid_ref[...]                                     # (B, H)

    # ---- embedding lookup as one-hot MXU matmul ----
    # TODO(synk): nn.Dropout(p=0.1) is identity here (inference / eval mode).
    emb = jnp.dot(onehot, slab_ref[EMB_OFF:EMB_OFF + EMB_ROWS, 0:H],
                  preferred_element_type=jnp.float32)      # (B, H)

    # ---- attn_weights = softmax(attn(cat(emb, hid))) as split matmuls ----
    att = (jnp.dot(emb, slab_ref[ATTN_E_OFF:ATTN_E_OFF + H, 0:L],
                   preferred_element_type=jnp.float32)
           + jnp.dot(hid, slab_ref[ATTN_H_OFF:ATTN_H_OFF + H, 0:L],
                     preferred_element_type=jnp.float32)
           + slab_ref[BIAS_OFF:BIAS_OFF + 1, 0:L])         # (B, L)
    att_m = jnp.max(att, axis=-1, keepdims=True)
    att_e = jnp.exp(att - att_m)
    attn_w = att_e / jnp.sum(att_e, axis=-1, keepdims=True)   # exact softmax

    # ---- attn_applied = bmm(attn_weights, encoder_outputs), per stream ----
    attn_applied = jnp.einsum('bql,blh->bqh', attn_w[:, None, :], enc_ref[...],
                              preferred_element_type=jnp.float32)[:, 0, :]   # (B, H)

    # ---- attn_combine(cat(emb, attn_applied)) + ReLU as split matmuls ----
    comb = (jnp.dot(emb, slab_ref[COMB_E_OFF:COMB_E_OFF + H, 0:H],
                    preferred_element_type=jnp.float32)
            + jnp.dot(attn_applied, slab_ref[COMB_A_OFF:COMB_A_OFF + H, 0:H],
                      preferred_element_type=jnp.float32)
            + slab_ref[BIAS_OFF + 1:BIAS_OFF + 2, 0:H])
    x = jnp.maximum(comb, 0.0)                             # (B, H)

    # ---- GRU cell (gate order r, z, n); gates repacked into one 96-lane tile ----
    g = (jnp.dot(x, slab_ref[GX_OFF:GX_OFF + H, 0:3 * H],
                 preferred_element_type=jnp.float32)
         + jnp.dot(hid, slab_ref[GH_OFF:GH_OFF + H, 0:3 * H],
                   preferred_element_type=jnp.float32)
         + slab_ref[BIAS_OFF + 2:BIAS_OFF + 3, 0:3 * H])   # (B, 3H) = [r|z|gi_n]
    r = jax.nn.sigmoid(g[:, 0:H])
    z = jax.nn.sigmoid(g[:, H:2 * H])
    gh_n = (jnp.dot(hid, slab_ref[HHN_OFF:HHN_OFF + H, 0:H],
                    preferred_element_type=jnp.float32)
            + slab_ref[BIAS_OFF + 3:BIAS_OFF + 4, 0:H])
    n = jnp.tanh(g[:, 2 * H:3 * H] + r * gh_n)
    h_new = (1.0 - z) * n + z * hid                        # (B, H)

    # ---- output linear + log_softmax ----
    out_logits = (jnp.dot(h_new, slab_ref[OUT_OFF:OUT_OFF + H, 0:O],
                          preferred_element_type=jnp.float32)
                  + slab_ref[BIAS_OFF + 4:BIAS_OFF + 5, 0:O])   # (B, O)
    m2 = jnp.max(out_logits, axis=-1, keepdims=True)
    lse = jnp.log(jnp.sum(jnp.exp(out_logits - m2), axis=-1, keepdims=True)) + m2
    logp = out_logits - lse

    # ---- greedy next token (first argmax) computed in-kernel ----
    lane = jax.lax.broadcasted_iota(jnp.int32, (B_TILE, O), 1).astype(jnp.float32)
    idx = jnp.min(jnp.where(out_logits == m2, lane, float(O)),
                  axis=-1, keepdims=True)                  # (B, 1), exact small int in f32
    emb_lane = jax.lax.broadcasted_iota(jnp.int32, (B_TILE, EMB_ROWS), 1).astype(jnp.float32)
    next_onehot = (emb_lane == idx).astype(jnp.float32)    # (B, EMB_ROWS)

    # ---- carry to next step ----
    hid_ref[...] = h_new
    oh_ref[...] = next_onehot

    # ---- lane-dense packed outputs: sub-slice stores (no concat chain) ----
    out_ref[:, 0:O] = logp
    out_ref[:, O:O + H] = h_new
    out_ref[:, O + H:O + H + L] = attn_w
    out_ref[:, TOK_COL:TOK_COL + 1] = idx
    out_ref[:, TOK_COL + 1:PACK_W] = jnp.zeros((B_TILE, PACK_W - TOK_COL - 1), jnp.float32)


@jax.jit
def attn_decoder_greedy_decode(tokens0, hidden0, encoder_outputs, slab):
    """Fused MAX_LENGTH-step greedy decode of the AttnDecoderRNN.

    tokens0: (B,) int32 start tokens; hidden0: (B, H) f32;
    encoder_outputs: (B, L, H) f32; slab: (SLAB_ROWS, SLAB_W) packed parameters.
    Returns per-step: log_probs (T,B,O), hiddens (T,B,H), attn_w (T,B,L), tokens (T,B).
    """
    H, L, O, T = HIDDEN, MAX_LENGTH, OUTPUT_SIZE, MAX_LENGTH
    B = tokens0.shape[0]
    assert B % B_TILE == 0
    nb = B // B_TILE

    onehot0 = jax.nn.one_hot(tokens0, EMB_ROWS, dtype=jnp.float32)   # (B, EMB_ROWS)

    packed = pl.pallas_call(
        attn_decoder_decode_kernel,
        out_shape=jax.ShapeDtypeStruct((T, B, PACK_W), jnp.float32),
        grid_spec=pltpu.PrefetchScalarGridSpec(
            num_scalar_prefetch=0,
            grid=(nb, T),
            in_specs=[
                pl.BlockSpec((B_TILE, EMB_ROWS), lambda b, t: (b, 0)),      # initial one-hot
                pl.BlockSpec((B_TILE, H), lambda b, t: (b, 0)),             # initial hidden
                pl.BlockSpec((B_TILE, L, H), lambda b, t: (b, 0, 0)),       # encoder outputs
                pl.BlockSpec((SLAB_ROWS, SLAB_W), lambda b, t: (0, 0)),     # weight slab (resident)
            ],
            out_specs=pl.BlockSpec((None, B_TILE, PACK_W), lambda b, t: (t, b, 0)),
            scratch_shapes=[
                pltpu.VMEM((B_TILE, EMB_ROWS), jnp.float32),   # next-token one-hot carry
                pltpu.VMEM((B_TILE, H), jnp.float32),          # hidden state carry
            ],
        ),
        compiler_params=pltpu.CompilerParams(
            dimension_semantics=("parallel", "arbitrary")),
    )(onehot0, hidden0.astype(jnp.float32), encoder_outputs.astype(jnp.float32), slab)

    log_probs = packed[:, :, 0:O]
    hiddens = packed[:, :, O:O + H]
    attn_w = packed[:, :, O + H:O + H + L]
    tokens = packed[:, :, TOK_COL].astype(jnp.int32)
    return log_probs, hiddens, attn_w, tokens


def pack_params(p):
    """Pack all weights/biases into one (SLAB_ROWS, 128) f32 slab (host, once)."""
    H, L, O = HIDDEN, MAX_LENGTH, OUTPUT_SIZE
    slab = jnp.zeros((SLAB_ROWS, SLAB_W), jnp.float32)
    slab = slab.at[EMB_OFF:EMB_OFF + O, 0:H].set(p["emb_table"])
    # attn linear: cat(emb, hid) @ W  ->  split rows
    slab = slab.at[ATTN_E_OFF:ATTN_E_OFF + H, 0:L].set(p["w_attn"][0:H])
    slab = slab.at[ATTN_H_OFF:ATTN_H_OFF + H, 0:L].set(p["w_attn"][H:2 * H])
    # attn_combine: cat(emb, attn_applied) @ W  ->  split rows
    slab = slab.at[COMB_E_OFF:COMB_E_OFF + H, 0:H].set(p["w_comb"][0:H])
    slab = slab.at[COMB_A_OFF:COMB_A_OFF + H, 0:H].set(p["w_comb"][H:2 * H])
    # GRU repack: x@W_gx + hid@W_gh -> [r_pre | z_pre | gi_n]  (single lane tile)
    slab = slab.at[GX_OFF:GX_OFF + H, 0:3 * H].set(p["w_ih"])
    slab = slab.at[GH_OFF:GH_OFF + H, 0:2 * H].set(p["w_hh"][:, 0:2 * H])
    slab = slab.at[HHN_OFF:HHN_OFF + H, 0:H].set(p["w_hh"][:, 2 * H:3 * H])
    slab = slab.at[OUT_OFF:OUT_OFF + H, 0:O].set(p["w_out"])
    # biases
    slab = slab.at[BIAS_OFF + 0, 0:L].set(p["b_attn"][0])
    slab = slab.at[BIAS_OFF + 1, 0:H].set(p["b_comb"][0])
    slab = slab.at[BIAS_OFF + 2, 0:2 * H].set(p["b_ih"][0, 0:2 * H] + p["b_hh"][0, 0:2 * H])
    slab = slab.at[BIAS_OFF + 2, 2 * H:3 * H].set(p["b_ih"][0, 2 * H:3 * H])
    slab = slab.at[BIAS_OFF + 3, 0:H].set(p["b_hh"][0, 2 * H:3 * H])
    slab = slab.at[BIAS_OFF + 4, 0:O].set(p["b_out"][0])
    return slab


def init_params(key, output_size=OUTPUT_SIZE, hidden_size=HIDDEN, max_length=MAX_LENGTH):
    ks = jax.random.split(key, 12)
    H, L, O = hidden_size, max_length, output_size
    scale = 0.1

    def rnd(k, shape):
        return (scale * jax.random.normal(k, shape)).astype(jnp.float32)

    return {
        "emb_table": rnd(ks[0], (O, H)),
        "w_attn": rnd(ks[1], (2 * H, L)), "b_attn": rnd(ks[2], (1, L)),
        "w_comb": rnd(ks[3], (2 * H, H)), "b_comb": rnd(ks[4], (1, H)),
        "w_ih": rnd(ks[5], (H, 3 * H)), "b_ih": rnd(ks[6], (1, 3 * H)),
        "w_hh": rnd(ks[7], (H, 3 * H)), "b_hh": rnd(ks[8], (1, 3 * H)),
        "w_out": rnd(ks[9], (H, O)), "b_out": rnd(ks[10], (1, O)),
    }


def reference_greedy_decode(tokens0, hidden0, enc, p, T):
    """Pure-JAX reference: PyTorch AttnDecoderRNN.forward (eval) unrolled greedily."""
    H = HIDDEN

    def step(carry, _):
        tok, hid = carry
        emb = p["emb_table"][tok]                                          # (B, H)
        att = jnp.concatenate([emb, hid], -1) @ p["w_attn"] + p["b_attn"]
        aw = jax.nn.softmax(att, axis=-1)                                  # (B, L)
        applied = jnp.einsum('bl,blh->bh', aw, enc)                        # (B, H)
        comb = jnp.concatenate([emb, applied], -1) @ p["w_comb"] + p["b_comb"]
        x = jnp.maximum(comb, 0.0)
        gi = x @ p["w_ih"] + p["b_ih"]
        gh = hid @ p["w_hh"] + p["b_hh"]
        r = jax.nn.sigmoid(gi[:, :H] + gh[:, :H])
        z = jax.nn.sigmoid(gi[:, H:2 * H] + gh[:, H:2 * H])
        n = jnp.tanh(gi[:, 2 * H:] + r * gh[:, 2 * H:])
        h_new = (1.0 - z) * n + z * hid
        logp = jax.nn.log_softmax(h_new @ p["w_out"] + p["b_out"], axis=-1)
        nxt = jnp.argmax(logp, axis=-1).astype(jnp.int32)
        return (nxt, h_new), (logp, h_new, aw, nxt)

    (_, _), (lps, hs, aws, toks) = jax.lax.scan(step, (tokens0, hidden0), None, length=T)
    return lps, hs, aws, toks


if __name__ == "__main__":
    key = jax.random.PRNGKey(0)
    pkey, hkey, ekey, tkey = jax.random.split(key, 4)

    B = 2 * B_TILE                                   # 16 decode streams, 2 batch blocks
    params = init_params(pkey)
    slab = pack_params(params)                       # one-time host packing

    tokens0 = jax.random.randint(tkey, (B,), 0, OUTPUT_SIZE, dtype=jnp.int32)
    hidden0 = 0.1 * jax.random.normal(hkey, (B, HIDDEN), dtype=jnp.float32)
    encoder_outputs = 0.1 * jax.random.normal(ekey, (B, MAX_LENGTH, HIDDEN), dtype=jnp.float32)

    log_probs, hiddens, attn_w, tokens = attn_decoder_greedy_decode(
        tokens0, hidden0, encoder_outputs, slab)
    jax.block_until_ready((log_probs, hiddens, attn_w, tokens))

    assert log_probs.shape == (MAX_LENGTH, B, OUTPUT_SIZE)
    assert hiddens.shape == (MAX_LENGTH, B, HIDDEN)
    assert attn_w.shape == (MAX_LENGTH, B, MAX_LENGTH)
    assert tokens.shape == (MAX_LENGTH, B)

    # softmax / log_softmax sanity
    assert float(jnp.max(jnp.abs(jnp.sum(jnp.exp(log_probs), -1) - 1.0))) < 1e-4
    assert float(jnp.max(jnp.abs(jnp.sum(attn_w, -1) - 1.0))) < 1e-4

    # correctness vs. pure-JAX reference of the PyTorch forward, greedily unrolled
    ref_lp, ref_h, ref_aw, ref_tok = reference_greedy_decode(
        tokens0, hidden0, encoder_outputs, params, MAX_LENGTH)
    assert float(jnp.max(jnp.abs(log_probs - ref_lp))) < 1e-3
    assert float(jnp.max(jnp.abs(hiddens - ref_h))) < 1e-3
    assert float(jnp.max(jnp.abs(attn_w - ref_aw))) < 1e-3
    assert bool(jnp.all(tokens == ref_tok))

    print("KERNEL_OK")
</pallas_src>

<mosaic_0001>
module attributes {stable_mosaic.version = 11 : i64} {
  func.func @attn_decoder_decode_kernel(%arg0: i32, %arg1: i32, %arg2: memref<8x24xf32, #tpu.memory_space<vmem>>, %arg3: memref<8x32xf32, #tpu.memory_space<vmem>>, %arg4: memref<8x10x32xf32, #tpu.memory_space<vmem>>, %arg5: memref<288x128xf32, #tpu.memory_space<vmem>>, %arg6: memref<1x8x128xf32, #tpu.memory_space<vmem>>, %arg7: memref<8x24xf32, #tpu.memory_space<vmem>>, %arg8: memref<8x32xf32, #tpu.memory_space<vmem>>) attributes {dimension_semantics = [#tpu.dimension_semantics<parallel>, #tpu.dimension_semantics<arbitrary>], iteration_bounds = array<i64: 2, 10>, scalar_prefetch = 0 : i64, scratch_operands = 2 : i64, tpu.core_type = #tpu.core_type<tc>, window_params = [{transform_indices = @transform_0, window_bounds = array<i64: 8, 24>}, {transform_indices = @transform_1, window_bounds = array<i64: 8, 32>}, {transform_indices = @transform_2, window_bounds = array<i64: 8, 10, 32>}, {pipeline_mode = #tpu.pipeline_mode<synchronous>, transform_indices = @transform_3, window_bounds = array<i64: 288, 128>}, {transform_indices = @transform_4, window_bounds = array<i64: 1, 8, 128>}]} {
    %c0_i32 = arith.constant 0 : i32
    %0 = arith.cmpi eq, %arg1, %c0_i32 : i32
    %1 = arith.extui %0 : i1 to i32
    %c0_i32_0 = arith.constant 0 : i32
    %2 = arith.cmpi ne, %1, %c0_i32_0 : i32
    scf.if %2 {
      %c0_57 = arith.constant 0 : index
      %c0_58 = arith.constant 0 : index
      %120 = vector.load %arg2[%c0_57, %c0_58] : memref<8x24xf32, #tpu.memory_space<vmem>>, vector<8x24xf32>
      %c0_59 = arith.constant 0 : index
      %c0_60 = arith.constant 0 : index
      %121 = vector.load %arg7[%c0_59, %c0_60] : memref<8x24xf32, #tpu.memory_space<vmem>>, vector<8x24xf32>
      tpu.vector_store %arg7[%c0_59, %c0_60], %120 {strides = array<i32>} : memref<8x24xf32, #tpu.memory_space<vmem>>, vector<8x24xf32>,
      %c0_61 = arith.constant 0 : index
      %c0_62 = arith.constant 0 : index
      %122 = vector.load %arg3[%c0_61, %c0_62] : memref<8x32xf32, #tpu.memory_space<vmem>>, vector<8x32xf32>
      %c0_63 = arith.constant 0 : index
      %c0_64 = arith.constant 0 : index
      %123 = vector.load %arg8[%c0_63, %c0_64] : memref<8x32xf32, #tpu.memory_space<vmem>>, vector<8x32xf32>
      tpu.vector_store %arg8[%c0_63, %c0_64], %122 {strides = array<i32>} : memref<8x32xf32, #tpu.memory_space<vmem>>, vector<8x32xf32>,
    } else {
    }
    %c0 = arith.constant 0 : index
    %c0_1 = arith.constant 0 : index
    %3 = vector.load %arg7[%c0, %c0_1] : memref<8x24xf32, #tpu.memory_space<vmem>>, vector<8x24xf32>
    %c0_2 = arith.constant 0 : index
    %c0_3 = arith.constant 0 : index
    %4 = vector.load %arg8[%c0_2, %c0_3] : memref<8x32xf32, #tpu.memory_space<vmem>>, vector<8x32xf32>
    %c0_4 = arith.constant 0 : index
    %c0_5 = arith.constant 0 : index
    %5 = vector.load %arg5[%c0_4, %c0_5] : memref<288x128xf32, #tpu.memory_space<vmem>>, vector<24x32xf32>
    %cst = arith.constant dense<0.000000e+00> : vector<8x32xf32>
    %6 = tpu.matmul %3, %5, %cst {dimension_numbers = #tpu.dot_dimension_numbers<[1], [0], [0], [1], [0, 0, 1, 1], [], []>, precision = #tpu.contract_precision<fp32>} : vector<8x24xf32>, vector<24x32xf32>, vector<8x32xf32> -> vector<8x32xf32>
    %c24 = arith.constant 24 : index
    %c0_6 = arith.constant 0 : index
    %7 = vector.load %arg5[%c24, %c0_6] : memref<288x128xf32, #tpu.memory_space<vmem>>, vector<32x10xf32>
    %cst_7 = arith.constant dense<0.000000e+00> : vector<8x10xf32>
    %8 = tpu.matmul %6, %7, %cst_7 {dimension_numbers = #tpu.dot_dimension_numbers<[1], [0], [0], [1], [0, 0, 1, 1], [], []>, precision = #tpu.contract_precision<fp32>} : vector<8x32xf32>, vector<32x10xf32>, vector<8x10xf32> -> vector<8x10xf32>
    %c56 = arith.constant 56 : index
    %c0_8 = arith.constant 0 : index
    %9 = vector.load %arg5[%c56, %c0_8] : memref<288x128xf32, #tpu.memory_space<vmem>>, vector<32x10xf32>
    %cst_9 = arith.constant dense<0.000000e+00> : vector<8x10xf32>
    %10 = tpu.matmul %4, %9, %cst_9 {dimension_numbers = #tpu.dot_dimension_numbers<[1], [0], [0], [1], [0, 0, 1, 1], [], []>, precision = #tpu.contract_precision<fp32>} : vector<8x32xf32>, vector<32x10xf32>, vector<8x10xf32> -> vector<8x10xf32>
    %11 = arith.addf %8, %10 : vector<8x10xf32>
    %c280 = arith.constant 280 : index
    %c0_10 = arith.constant 0 : index
    %12 = vector.load %arg5[%c280, %c0_10] : memref<288x128xf32, #tpu.memory_space<vmem>>, vector<1x10xf32>
    %13 = vector.broadcast %12 : vector<1x10xf32> to vector<8x10xf32>
    %14 = arith.addf %11, %13 : vector<8x10xf32>
    %cst_11 = arith.constant dense<0xFF800000> : vector<8xf32>
    %15 = vector.multi_reduction <maximumf>, %14, %cst_11 [1] : vector<8x10xf32> to vector<8xf32>
    %16 = vector.shape_cast %15 : vector<8xf32> to vector<8x1xf32>
    %17 = vector.broadcast %16 : vector<8x1xf32> to vector<8x10xf32>
    %18 = arith.subf %14, %17 : vector<8x10xf32>
    %19 = math.exp %18 : vector<8x10xf32>
    %cst_12 = arith.constant dense<0.000000e+00> : vector<8xf32>
    %20 = vector.multi_reduction <add>, %19, %cst_12 [1] : vector<8x10xf32> to vector<8xf32>
    %21 = vector.shape_cast %20 : vector<8xf32> to vector<8x1xf32>
    %22 = vector.broadcast %21 : vector<8x1xf32> to vector<8x10xf32>
    %23 = arith.divf %19, %22 : vector<8x10xf32>
    %24 = vector.shape_cast %23 : vector<8x10xf32> to vector<8x1x10xf32>
    %c0_13 = arith.constant 0 : index
    %c0_14 = arith.constant 0 : index
    %c0_15 = arith.constant 0 : index
    %25 = vector.load %arg4[%c0_13, %c0_14, %c0_15] : memref<8x10x32xf32, #tpu.memory_space<vmem>>, vector<8x10x32xf32>
    "tpu.trace_start"() <{level = 10 : i32, message = "bql,blh->bqh"}> : () -> ()
    %cst_16 = arith.constant dense<0.000000e+00> : vector<8x1x32xf32>
    %26 = tpu.matmul %24, %25, %cst_16 {dimension_numbers = #tpu.dot_dimension_numbers<[2], [1], [1], [2], [0, 0, 0, 1, 1, 2], [0], [0]>, precision = #tpu.contract_precision<fp32>} : vector<8x1x10xf32>, vector<8x10x32xf32>, vector<8x1x32xf32> -> vector<8x1x32xf32>
    "tpu.trace_stop"() : () -> ()
    %27 = vector.shape_cast %26 : vector<8x1x32xf32> to vector<8x32xf32>
    %c88 = arith.constant 88 : index
    %c0_17 = arith.constant 0 : index
    %28 = vector.load %arg5[%c88, %c0_17] : memref<288x128xf32, #tpu.memory_space<vmem>>, vector<32x32xf32>
    %cst_18 = arith.constant dense<0.000000e+00> : vector<8x32xf32>
    %29 = tpu.matmul %6, %28, %cst_18 {dimension_numbers = #tpu.dot_dimension_numbers<[1], [0], [0], [1], [0, 0, 1, 1], [], []>, precision = #tpu.contract_precision<fp32>} : vector<8x32xf32>, vector<32x32xf32>, vector<8x32xf32> -> vector<8x32xf32>
    %c120 = arith.constant 120 : index
    %c0_19 = arith.constant 0 : index
    %30 = vector.load %arg5[%c120, %c0_19] : memref<288x128xf32, #tpu.memory_space<vmem>>, vector<32x32xf32>
    %cst_20 = arith.constant dense<0.000000e+00> : vector<8x32xf32>
    %31 = tpu.matmul %27, %30, %cst_20 {dimension_numbers = #tpu.dot_dimension_numbers<[1], [0], [0], [1], [0, 0, 1, 1], [], []>, precision = #tpu.contract_precision<fp32>} : vector<8x32xf32>, vector<32x32xf32>, vector<8x32xf32> -> vector<8x32xf32>
    %32 = arith.addf %29, %31 : vector<8x32xf32>
    %c281 = arith.constant 281 : index
    %c0_21 = arith.constant 0 : index
    %33 = vector.load %arg5[%c281, %c0_21] : memref<288x128xf32, #tpu.memory_space<vmem>>, vector<1x32xf32>
    %34 = vector.broadcast %33 : vector<1x32xf32> to vector<8x32xf32>
    %35 = arith.addf %32, %34 : vector<8x32xf32>
    %cst_22 = arith.constant 0.000000e+00 : f32
    %36 = vector.broadcast %cst_22 : f32 to vector<8x32xf32>
    %37 = arith.maximumf %35, %36 : vector<8x32xf32>
    %c152 = arith.constant 152 : index
    %c0_23 = arith.constant 0 : index
    %38 = vector.load %arg5[%c152, %c0_23] : memref<288x128xf32, #tpu.memory_space<vmem>>, vector<32x96xf32>
    %cst_24 = arith.constant dense<0.000000e+00> : vector<8x96xf32>
    %39 = tpu.matmul %37, %38, %cst_24 {dimension_numbers = #tpu.dot_dimension_numbers<[1], [0], [0], [1], [0, 0, 1, 1], [], []>, precision = #tpu.contract_precision<fp32>} : vector<8x32xf32>, vector<32x96xf32>, vector<8x96xf32> -> vector<8x96xf32>
    %c184 = arith.constant 184 : index
    %c0_25 = arith.constant 0 : index
    %40 = vector.load %arg5[%c184, %c0_25] : memref<288x128xf32, #tpu.memory_space<vmem>>, vector<32x96xf32>
    %cst_26 = arith.constant dense<0.000000e+00> : vector<8x96xf32>
    %41 = tpu.matmul %4, %40, %cst_26 {dimension_numbers = #tpu.dot_dimension_numbers<[1], [0], [0], [1], [0, 0, 1, 1], [], []>, precision = #tpu.contract_precision<fp32>} : vector<8x32xf32>, vector<32x96xf32>, vector<8x96xf32> -> vector<8x96xf32>
    %42 = arith.addf %39, %41 : vector<8x96xf32>
    %c282 = arith.constant 282 : index
    %c0_27 = arith.constant 0 : index
    %43 = vector.load %arg5[%c282, %c0_27] : memref<288x128xf32, #tpu.memory_space<vmem>>, vector<1x96xf32>
    %44 = vector.broadcast %43 : vector<1x96xf32> to vector<8x96xf32>
    %45 = arith.addf %42, %44 : vector<8x96xf32>
    %46 = vector.extract_strided_slice %45 {offsets = [0, 0], sizes = [8, 32], strides = [1, 1]} : vector<8x96xf32> to vector<8x32xf32>
    %47 = arith.negf %46 : vector<8x32xf32>
    %48 = math.exp %47 : vector<8x32xf32>
    %cst_28 = arith.constant 1.000000e+00 : f32
    %49 = vector.broadcast %cst_28 : f32 to vector<8x32xf32>
    %50 = arith.addf %49, %48 : vector<8x32xf32>
    %51 = arith.divf %49, %50 : vector<8x32xf32>
    %52 = vector.extract_strided_slice %45 {offsets = [0, 32], sizes = [8, 32], strides = [1, 1]} : vector<8x96xf32> to vector<8x32xf32>
    %53 = arith.negf %52 : vector<8x32xf32>
    %54 = math.exp %53 : vector<8x32xf32>
    %cst_29 = arith.constant 1.000000e+00 : f32
    %55 = vector.broadcast %cst_29 : f32 to vector<8x32xf32>
    %56 = arith.addf %55, %54 : vector<8x32xf32>
    %57 = arith.divf %55, %56 : vector<8x32xf32>
    %c216 = arith.constant 216 : index
    %c0_30 = arith.constant 0 : index
    %58 = vector.load %arg5[%c216, %c0_30] : memref<288x128xf32, #tpu.memory_space<vmem>>, vector<32x32xf32>
    %cst_31 = arith.constant dense<0.000000e+00> : vector<8x32xf32>
    %59 = tpu.matmul %4, %58, %cst_31 {dimension_numbers = #tpu.dot_dimension_numbers<[1], [0], [0], [1], [0, 0, 1, 1], [], []>, precision = #tpu.contract_precision<fp32>} : vector<8x32xf32>, vector<32x32xf32>, vector<8x32xf32> -> vector<8x32xf32>
    %c283 = arith.constant 283 : index
    %c0_32 = arith.constant 0 : index
    %60 = vector.load %arg5[%c283, %c0_32] : memref<288x128xf32, #tpu.memory_space<vmem>>, vector<1x32xf32>
    %61 = vector.broadcast %60 : vector<1x32xf32> to vector<8x32xf32>
    %62 = arith.addf %59, %61 : vector<8x32xf32>
    %63 = vector.extract_strided_slice %45 {offsets = [0, 64], sizes = [8, 32], strides = [1, 1]} : vector<8x96xf32> to vector<8x32xf32>
    %64 = arith.mulf %51, %62 : vector<8x32xf32>
    %65 = arith.addf %63, %64 : vector<8x32xf32>
    %66 = math.tanh %65 : vector<8x32xf32>
    %cst_33 = arith.constant 1.000000e+00 : f32
    %67 = vector.broadcast %cst_33 : f32 to vector<8x32xf32>
    %68 = arith.subf %67, %57 : vector<8x32xf32>
    %69 = arith.mulf %68, %66 : vector<8x32xf32>
    %70 = arith.mulf %57, %4 : vector<8x32xf32>
    %71 = arith.addf %69, %70 : vector<8x32xf32>
    %c248 = arith.constant 248 : index
    %c0_34 = arith.constant 0 : index
    %72 = vector.load %arg5[%c248, %c0_34] : memref<288x128xf32, #tpu.memory_space<vmem>>, vector<32x20xf32>
    %cst_35 = arith.constant dense<0.000000e+00> : vector<8x20xf32>
    %73 = tpu.matmul %71, %72, %cst_35 {dimension_numbers = #tpu.dot_dimension_numbers<[1], [0], [0], [1], [0, 0, 1, 1], [], []>, precision = #tpu.contract_precision<fp32>} : vector<8x32xf32>, vector<32x20xf32>, vector<8x20xf32> -> vector<8x20xf32>
    %c284 = arith.constant 284 : index
    %c0_36 = arith.constant 0 : index
    %74 = vector.load %arg5[%c284, %c0_36] : memref<288x128xf32, #tpu.memory_space<vmem>>, vector<1x20xf32>
    %75 = vector.broadcast %74 : vector<1x20xf32> to vector<8x20xf32>
    %76 = arith.addf %73, %75 : vector<8x20xf32>
    %cst_37 = arith.constant dense<0xFF800000> : vector<8xf32>
    %77 = vector.multi_reduction <maximumf>, %76, %cst_37 [1] : vector<8x20xf32> to vector<8xf32>
    %78 = vector.shape_cast %77 : vector<8xf32> to vector<8x1xf32>
    %79 = vector.broadcast %78 : vector<8x1xf32> to vector<8x20xf32>
    %80 = arith.subf %76, %79 : vector<8x20xf32>
    %81 = math.exp %80 : vector<8x20xf32>
    %cst_38 = arith.constant dense<0.000000e+00> : vector<8xf32>
    %82 = vector.multi_reduction <add>, %81, %cst_38 [1] : vector<8x20xf32> to vector<8xf32>
    %83 = vector.shape_cast %82 : vector<8xf32> to vector<8x1xf32>
    %84 = math.log %83 : vector<8x1xf32>
    %85 = arith.addf %84, %78 : vector<8x1xf32>
    %86 = vector.broadcast %85 : vector<8x1xf32> to vector<8x20xf32>
    %87 = arith.subf %76, %86 : vector<8x20xf32>
    %88 = tpu.iota {dimensions = array<i32: 1>} : vector<8x20xi32>
    %89 = arith.sitofp %88 : vector<8x20xi32> to vector<8x20xf32>
    %90 = vector.broadcast %78 : vector<8x1xf32> to vector<8x20xf32>
    %91 = arith.cmpf oeq, %76, %90 : vector<8x20xf32>
    %cst_39 = arith.constant 2.000000e+01 : f32
    %92 = vector.broadcast %cst_39 : f32 to vector<8x20xf32>
    %93 = arith.select %91, %89, %92 : vector<8x20xi1>, vector<8x20xf32>
    %cst_40 = arith.constant dense<0x7F800000> : vector<8xf32>
    %94 = vector.multi_reduction <minimumf>, %93, %cst_40 [1] : vector<8x20xf32> to vector<8xf32>
    %95 = vector.shape_cast %94 : vector<8xf32> to vector<8x1xf32>
    %96 = tpu.iota {dimensions = array<i32: 1>} : vector<8x24xi32>
    %97 = arith.sitofp %96 : vector<8x24xi32> to vector<8x24xf32>
    %98 = vector.broadcast %95 : vector<8x1xf32> to vector<8x24xf32>
    %99 = arith.cmpf oeq, %97, %98 : vector<8x24xf32>
    %100 = arith.extui %99 : vector<8x24xi1> to vector<8x24xi32>
    %101 = arith.sitofp %100 : vector<8x24xi32> to vector<8x24xf32>
    %c0_41 = arith.constant 0 : index
    %c0_42 = arith.constant 0 : index
    %102 = vector.load %arg8[%c0_41, %c0_42] : memref<8x32xf32, #tpu.memory_space<vmem>>, vector<8x32xf32>
    tpu.vector_store %arg8[%c0_41, %c0_42], %71 {strides = array<i32>} : memref<8x32xf32, #tpu.memory_space<vmem>>, vector<8x32xf32>,
    %c0_43 = arith.constant 0 : index
    %c0_44 = arith.constant 0 : index
    %103 = vector.load %arg7[%c0_43, %c0_44] : memref<8x24xf32, #tpu.memory_space<vmem>>, vector<8x24xf32>
    tpu.vector_store %arg7[%c0_43, %c0_44], %101 {strides = array<i32>} : memref<8x24xf32, #tpu.memory_space<vmem>>, vector<8x24xf32>,
    %c0_45 = arith.constant 0 : index
    %c0_46 = arith.constant 0 : index
    %c0_47 = arith.constant 0 : index
    %104 = vector.load %arg6[%c0_45, %c0_46, %c0_47] : memref<1x8x128xf32, #tpu.memory_space<vmem>>, vector<1x8x20xf32>
    %105 = vector.shape_cast %104 : vector<1x8x20xf32> to vector<8x20xf32>
    %106 = vector.shape_cast %87 : vector<8x20xf32> to vector<1x8x20xf32>
    tpu.vector_store %arg6[%c0_45, %c0_46, %c0_47], %106 {strides = array<i32>} : memref<1x8x128xf32, #tpu.memory_space<vmem>>, vector<1x8x20xf32>,
    %c0_48 = arith.constant 0 : index
    %c0_49 = arith.constant 0 : index
    %c20 = arith.constant 20 : index
    %107 = vector.load %arg6[%c0_48, %c0_49, %c20] : memref<1x8x128xf32, #tpu.memory_space<vmem>>, vector<1x8x32xf32>
    %108 = vector.shape_cast %107 : vector<1x8x32xf32> to vector<8x32xf32>
    %109 = vector.shape_cast %71 : vector<8x32xf32> to vector<1x8x32xf32>
    tpu.vector_store %arg6[%c0_48, %c0_49, %c20], %109 {strides = array<i32>} : memref<1x8x128xf32, #tpu.memory_space<vmem>>, vector<1x8x32xf32>,
    %c0_50 = arith.constant 0 : index
    %c0_51 = arith.constant 0 : index
    %c52 = arith.constant 52 : index
    %110 = vector.load %arg6[%c0_50, %c0_51, %c52] : memref<1x8x128xf32, #tpu.memory_space<vmem>>, vector<1x8x10xf32>
    %111 = vector.shape_cast %110 : vector<1x8x10xf32> to vector<8x10xf32>
    %112 = vector.shape_cast %23 : vector<8x10xf32> to vector<1x8x10xf32>
    tpu.vector_store %arg6[%c0_50, %c0_51, %c52], %112 {strides = array<i32>} : memref<1x8x128xf32, #tpu.memory_space<vmem>>, vector<1x8x10xf32>,
    %c0_52 = arith.constant 0 : index
    %c0_53 = arith.constant 0 : index
    %c62 = arith.constant 62 : index
    %113 = vector.load %arg6[%c0_52, %c0_53, %c62] : memref<1x8x128xf32, #tpu.memory_space<vmem>>, vector<1x8x1xf32>
    %114 = vector.shape_cast %113 : vector<1x8x1xf32> to vector<8x1xf32>
    %115 = vector.shape_cast %95 : vector<8x1xf32> to vector<1x8x1xf32>
    tpu.vector_store %arg6[%c0_52, %c0_53, %c62], %115 {strides = array<i32>} : memref<1x8x128xf32, #tpu.memory_space<vmem>>, vector<1x8x1xf32>,
    %cst_54 = arith.constant 0.000000e+00 : f32
    %116 = vector.broadcast %cst_54 : f32 to vector<8x65xf32>
    %c0_55 = arith.constant 0 : index
    %c0_56 = arith.constant 0 : index
    %c63 = arith.constant 63 : index
    %117 = vector.load %arg6[%c0_55, %c0_56, %c63] : memref<1x8x128xf32, #tpu.memory_space<vmem>>, vector<1x8x65xf32>
    %118 = vector.shape_cast %117 : vector<1x8x65xf32> to vector<8x65xf32>
    %119 = vector.shape_cast %116 : vector<8x65xf32> to vector<1x8x65xf32>
    tpu.vector_store %arg6[%c0_55, %c0_56, %c63], %119 {strides = array<i32>} : memref<1x8x128xf32, #tpu.memory_space<vmem>>, vector<1x8x65xf32>,
    return
  }
  func.func @transform_0(%arg0: i32, %arg1: i32) -> (i32, i32) {
    %c0_i32 = arith.constant 0 : i32
    %c0_i32_0 = arith.constant 0 : i32
    return %arg0, %c0_i32 : i32, i32
  }
  func.func @transform_1(%arg0: i32, %arg1: i32) -> (i32, i32) {
    %c0_i32 = arith.constant 0 : i32
    %c0_i32_0 = arith.constant 0 : i32
    return %arg0, %c0_i32 : i32, i32
  }
  func.func @transform_2(%arg0: i32, %arg1: i32) -> (i32, i32, i32) {
    %c0_i32 = arith.constant 0 : i32
    %c0_i32_0 = arith.constant 0 : i32
    %c0_i32_1 = arith.constant 0 : i32
    return %arg0, %c0_i32, %c0_i32_0 : i32, i32, i32
  }
  func.func @transform_3(%arg0: i32, %arg1: i32) -> (i32, i32) {
    %c0_i32 = arith.constant 0 : i32
    %c0_i32_0 = arith.constant 0 : i32
    %c0_i32_1 = arith.constant 0 : i32
    return %c0_i32, %c0_i32_0 : i32, i32
  }
  func.func @transform_4(%arg0: i32, %arg1: i32) -> (i32, i32, i32) {
    %c0_i32 = arith.constant 0 : i32
    %c0_i32_0 = arith.constant 0 : i32
    return %arg1, %arg0, %c0_i32 : i32, i32, i32
  }
}

</mosaic_0001>

<bundles_post_ra>
// kernel: attn_decoder_greedy_decode.1
= control target key start
LH: loop header
LB: loop body
LE: loop exit
PB: predicated region body
PF: predicated region fallthrough
CT: control target
= control target key end

     0   :  { %s3721_s15 = smov 0   ;;  %s3723_s16 = smov 0   ;;  %s4478_s0 = inlined_call_operand.vmem [shape: f32[16,24], index: 0, kind: input, shape index: {}]   ;;  %s4479_s1 = inlined_call_operand.vmem [shape: f32[16,32], index: 1, kind: input, shape index: {}]   ;;  %s4480_s2 = inlined_call_operand.vmem [shape: f32[16,10,32], index: 2, kind: input, shape index: {}]   ;;  %s4481_s3 = inlined_call_operand.vmem [shape: f32[288,128], index: 3, kind: input, shape index: {}]   ;;  %s4482_s4 = inlined_call_operand.vmem [shape: f32[10,16,128], index: 4, kind: output, shape index: {}]  }
   0x1   :  { %s3725_s17 = smov 0   ;;  %s3727_s18 = smov 0  }
   0x2   :  { %s3729_s19 = smov 0  }
   0x3 LB: > { %s23_s20 = sadd.s32 1, %s3680_s17  ;;  %s26_s21 = sadd.s32 1, %s3684_s18  ;;  %s3688_s19 = sphi %s3729_s19, %s14_s19   ;;  %s3684_s18 = sphi %s3727_s18, %s4486_s18   ;;  %s3680_s17 = sphi %s3725_s17, %s4485_s17   ;;  %s3676_s16 = sphi %s3723_s16, %s4484_s16   ;;  %s3672_s15 = sphi %s3721_s15, %s4483_s15  }
   0x4   : > { %p24_p0 = scmp.ge.s32.totalorder %s23_s20, 10  ;;  %p3570_p1 = scmp.ge.s32.totalorder %s3688_s19, 1 }
   0x5   : > { %p196_p2 = scmp.lt.s32.totalorder %s3688_s19, 21 }
   0x6   : > { %s4488_s20 = smov (%p24_p0, %s23_s20), 0  ;;  %s4490_s21 = smov (!%p24_p0, %s26_s21), %s3684_s18 }
   0x7   : > { %p197_p3 = pnand %p3570_p1, %p196_p2  ;;  %p28_p4 = scmp.ge.s32.totalorder %s4490_s21, 2 }
   0x8   : > { %p234_p5 = scmp.lt.s32.totalorder (!%p197_p3), %s3676_s16, 1  ;;  %s3573_s22 = sshll.u32 (!%p197_p3), %s3676_s16, 3 }
   0x9   : > { %s4492_s21 = smov (%p28_p4, %s4490_s21), 0  ;;  %200 = sbr.rel (%p197_p3) target bundleno = 1937 (0x791), region = 36 }
   0xa   : > { %p243_p6 = scmp.lt.s32.totalorder (!%p197_p3), %s3573_s22, 15  ;;  %p249_p7 = scmp.lt.s32.totalorder (!%p197_p3), %s3672_s15, 9 }
   0xb   : > { %p3578_p8 = scmp.ne.s32.totalorder (!%p197_p3), %s3672_s15, 0 }
   0xe   : > { %s4494_s16 = smov (!%p234_p5, %s3676_s16), 1  ;;  %s4496_s22 = smov (!%p243_p6, %s3573_s22), 15 }
   0xf   : > { %s3571_s23 = sshll.u32 %s4494_s16, 3  ;;  %s3583_s30 = sshll.u32 %s4496_s22, 4 }
  0x10   : > { %s237_s26 = scalar_lea.vmem %s4478_s0, %s3571_s23  ;;  %s241_s29 = scalar_lea.vmem %s4479_s1, %s3571_s23 }
  0x11   : > { %s3763_s7 = scalar_lea.vmem %s4480_s2, %s3583_s30 }
  0x12   : > { %s250_s8 = scalar_select %p249_p7, %s3672_s15, 9 }
  0x13   : > { %260 = sbr.rel (%p3578_p8) target bundleno = 27 (0x1b), region = 40 }
  0x14   : > { %s3576_s9 = sshll.u32 %s250_s8, 1 }
  0x15   : > { %s254_s10 = sadd.s32 %s3576_s9, %s4494_s16 }
  0x16   : > { %s3577_s11 = sshll.u32 %s254_s10, 3 }
  0x17   : > { %s3769_s14 = scalar_lea.vmem %s4482_s4, %s3577_s11 }
  0x18   : > { %v261_v0 = vld [vmem:[%s237_s26] sm:$0xff]  ;;  %vm262_vm0 = vcmask 195584   ;;  %vm265_vm1 = vcmask 261120  }
  0x19   : > { %v264_v1 = vld [vmem:[%s241_s29] sm:$0xff]  ;;  %263 = vst.msk [vmem:[#allocation2] sm:$0xff] %vm262_vm0, %v261_v0 }
  0x1a   : > { %266 = vst.msk [vmem:[#allocation3] sm:$0xff] %vm265_vm1, %v264_v1 }
  0x1b PF: > { %v271_v2 = vld [vmem:[%s4481_s3 + $0x10] sm:$0xff]  ;;  %v270_v3 = vld [vmem:[%s4481_s3 + $0x8] sm:$0xff]  ;;  %v269_v4 = vld [vmem:[%s4481_s3] sm:$0xff]  ;;  %vm272_vm2 = vcmask 195584   ;;  %vm456_vm3 = vcmask 261120   ;;  %vm836_vm4 = vcmask 80896  }
  0x1c   : > { %v289_v5 = vand.u32 4294901760, %v271_v2  ;;  %v291_v6 = vand.u32 4294901760, %v270_v3  ;;  %v293_v7 = vand.u32 4294901760, %v269_v4  ;;  %v455_v9 = vld [vmem:[%s4481_s3 + $0x50] sm:$0xff]  ;;  %v454_v10 = vld [vmem:[%s4481_s3 + $0x48] sm:$0xff]  ;;  %v453_v39 = vld [vmem:[%s4481_s3 + $0x40] sm:$0xff] }
  0x1d   : > { %v3788_v12 = vand.u32 4294901760, %v455_v9  ;;  %v3790_v13 = vand.u32 4294901760, %v454_v10  ;;  %v3809_v40 = vand.u32 4294901760, %v453_v39  ;;  %v452_v43 = vld [vmem:[%s4481_s3 + $0x38] sm:$0xff]  ;;  %v451_v54 = vld [vmem:[%s4481_s3 + $0x30] sm:$0xff]  ;;  %v450_v59 = vld [vmem:[%s4481_s3 + $0x28] sm:$0xff] }
  0x1e   : > { %v318_v14 = vsub.f32 %v271_v2, %v289_v5  ;;  %290 = vmatpush.msra.mxu0 %v289_v5  ;;  %v324_v15 = vsub.f32 %v270_v3, %v291_v6  ;;  %382 = vmatpush.msra.mxu3 %v289_v5  ;;  %v330_v16 = vsub.f32 %v269_v4, %v293_v7  ;;  %v478_v45 = vand.u32 4294901760, %v452_v43  ;;  %v449_v63 = vld [vmem:[%s4481_s3 + $0x20] sm:$0xff]  ;;  %v448_v3 = vld [vmem:[%s4481_s3 + $0x18] sm:$0xff]  ;;  %s3690_s23 = smov 32   ;;  %s3691_s5 = smov 64  }
  0x1f   : > { %v3793_v18 = vsub.f32 %v455_v9, %v3788_v12  ;;  %v3796_v19 = vsub.f32 %v454_v10, %v3790_v13  ;;  %v514_v46 = vsub.f32 %v453_v39, %v3809_v40  ;;  %v660_v57 = vand.u32 4294901760, %v451_v54  ;;  %s3692_s6 = smov 96   ;;  %s3693_s25 = smov 116  }
  0x20   : > { %v267_v8 = vld [vmem:[#allocation2] sm:$0xff]  ;;  %355 = vmatpush.msra.mxu2 %v318_v14  ;;  %292 = vmatpush.msra.mxu0 %v291_v6  ;;  %v319_v20 = vand.u32 4294901760, %v318_v14  ;;  %v325_v22 = vand.u32 4294901760, %v324_v15  ;;  %v331_v23 = vand.u32 4294901760, %v330_v16  ;;  %v520_v49 = vsub.f32 %v452_v43, %v478_v45 }
  0x21   : > { %v274_v11 = vsel %vm272_vm2, %v267_v8, 0  ;;  %384 = vmatpush.msra.mxu3 %v291_v6  ;;  %v503_v24 = vand.u32 4294901760, %v3793_v18  ;;  %v509_v25 = vand.u32 4294901760, %v3796_v19  ;;  %v268_v41 = vld [vmem:[#allocation3] sm:$0xff]  ;;  %v515_v48 = vand.u32 4294901760, %v514_v46 }
  0x22   : > { %v295_v17 = vand.u32 4294901760, %v274_v11  ;;  %358 = vmatpush.msra.mxu2 %v324_v15  ;;  %v320_v26 = vsub.f32 %v318_v14, %v319_v20  ;;  %294 = vmatpush.msra.mxu0 %v293_v7  ;;  %v326_v27 = vsub.f32 %v324_v15, %v325_v22  ;;  %v332_v29 = vsub.f32 %v330_v16, %v331_v23 }
  0x23   : > { %386 = vmatpush.msra.mxu3 %v293_v7  ;;  %v504_v30 = vsub.f32 %v3793_v18, %v503_v24  ;;  %v510_v31 = vsub.f32 %v3796_v19, %v509_v25  ;;  %v458_v42 = vsel %vm456_vm3, %v268_v41, 0  ;;  %v516_v51 = vsub.f32 %v514_v46, %v515_v48 }
  0x24   : > { %v296_v21 = vsub.f32 %v274_v11, %v295_v17  ;;  %410 = vmatpush.msrb.mxu0 %v319_v20  ;;  %v321_v32 = vand.u32 4294901760, %v320_v26  ;;  %361 = vmatpush.msra.mxu2 %v330_v16  ;;  %v327_v33 = vand.u32 4294901760, %v326_v27  ;;  %v333_v38 = vand.u32 4294901760, %v332_v29 }
  0x25   : > { %v505_v35 = vand.u32 4294901760, %v504_v30  ;;  %v511_v36 = vand.u32 4294901760, %v510_v31  ;;  %v3821_v44 = vand.u32 4294901760, %v458_v42  ;;  %v521_v52 = vand.u32 4294901760, %v520_v49 }
  0x26   : > { %v297_v28 = vand.u32 4294901760, %v296_v21  ;;  %364 = vmatmul.f32.vlgmr.msra.gmra.mxu2 %v296_v21  ;;  %414 = vmatpush.msrb.mxu0 %v325_v22  ;;  %v517_v55 = vand.u32 4294901760, %v516_v51  ;;  %v690_v61 = vsub.f32 %v451_v54, %v660_v57  ;;  %v662_v62 = vand.u32 4294901760, %v450_v59 }
  0x27   : > { %322 = vmatpush.msra.mxu1 %v321_v32  ;;  %473 = vmatpush.msrb.mxu2 %v3788_v12  ;;  %v3825_v47 = vsub.f32 %v458_v42, %v3821_v44  ;;  %v522_v56 = vsub.f32 %v520_v49, %v521_v52  ;;  %v664_v2 = vand.u32 4294901760, %v449_v63  ;;  %vm887_vm5 = vcmask 1041408  }
  0x28   : > { %v298_v34 = vsub.f32 %v296_v21, %v297_v28  ;;  %390 = vmatmul.f32.vlgmr.msra.gmra.mxu3 %v297_v28  ;;  %418 = vmatpush.msrb.mxu0 %v331_v23  ;;  %v691_v0 = vand.u32 4294901760, %v690_v61  ;;  %v696_v1 = vsub.f32 %v450_v59, %v662_v62  ;;  %vm2215_vm10 = vcmask 1041409  }
  0x29   : > { %506 = vmatpush.msrb.mxu3 %v505_v35  ;;  %328 = vmatpush.msra.mxu1 %v327_v33  ;;  %v3828_v50 = vand.u32 4294901760, %v3825_v47  ;;  %v523_v60 = vand.u32 4294901760, %v522_v56  ;;  %vm2218_vm11 = vcmask 1042434   ;;  %vm2221_vm12 = vcmask 1043459  }
  0x2a   : > { %v299_v37 = vand.u32 4294901760, %v298_v34  ;;  %475 = vmatpush.msrb.mxu2 %v3790_v13  ;;  %v692_v4 = vsub.f32 %v690_v61, %v691_v0  ;;  %vm2224_vm13 = vcmask 1044484   ;;  %vm2227_vm14 = vcmask 1045509  }
  0x2b   : > { %512 = vmatpush.msrb.mxu3 %v511_v36  ;;  %334 = vmatpush.msra.mxu1 %v333_v38  ;;  %v483_v53 = vsub.f32 %v3825_v47, %v3828_v50  ;;  %vm2230_vm15 = vcmask 1046534   ;;  %vm2233_vm0 = vcmask 1047559  }
  0x2c   : > { %300 = vmatmul.f32.vlgmr.msra.gmra.mxu0 %v299_v37  ;;  %336 = vmatmul.f32.vlgmr.msra.gmra.mxu1 %v295_v17  ;;  %v693_v8 = vand.u32 4294901760, %v692_v4 }
  0x2d   : > { %544 = vmatpush.msra.mxu0 %v3793_v18  ;;  %477 = vmatpush.msrb.mxu2 %v3809_v40  ;;  %v3838_v58 = vand.u32 4294901760, %v483_v53 }
  0x2e   : > { %438 = vmatpush.msrb.mxu1 %v289_v5  ;;  %518 = vmatpush.msrb.mxu3 %v517_v55  ;;  %v697_v5 = vand.u32 4294901760, %v696_v1 }
  0x2f   : > { %547 = vmatpush.msra.mxu0 %v3796_v19  ;;  %479 = vmatpush.msrb.mxu2 %v478_v45 }
  0x30   : > { %440 = vmatpush.msrb.mxu1 %v291_v6  ;;  %485 = vmatmul.f32.vlgmr.msrb.gmra.mxu2 %v3838_v58  ;;  %v702_v6 = vsub.f32 %v449_v63, %v664_v2  ;;  %v698_v9 = vsub.f32 %v696_v1, %v697_v5 }
  0x31   : > { %602 = vmatpush.msra.mxu2 %v503_v24  ;;  %550 = vmatpush.msra.mxu0 %v514_v46 }
  0x32   : > { %442 = vmatpush.msrb.mxu1 %v293_v7  ;;  %524 = vmatpush.msrb.mxu3 %v523_v60  ;;  %v666_v7 = vand.u32 4294901760, %v448_v3  ;;  %v703_v10 = vand.u32 4294901760, %v702_v6  ;;  %v699_v14 = vand.u32 4294901760, %v698_v9  ;;  %v3630_v60 = vld [vmem:[%s4481_s3 + $0x118] ss:$0 sm:$0xff]  ;;  %v869_v9 = vld [vmem:[%s3763_s7] sm:$0xff] }
  0x33   : > { %606 = vmatpush.msra.mxu2 %v509_v25  ;;  %553 = vmatpush.msra.mxu0 %v520_v49 }
  0x34   : > { %420 = vmatmul.f32.vlgmr.msrb.gmra.mxu0 %v295_v17  ;;  %573 = vmatpush.msra.mxu1 %v3788_v12  ;;  %v708_v11 = vsub.f32 %v448_v3, %v666_v7  ;;  %v704_v15 = vsub.f32 %v702_v6, %v703_v10 }
  0x35   : > { %444 = vmatmul.f32.vlgmr.msrb.gmra.mxu1 %v295_v17  ;;  %610 = vmatpush.msra.mxu2 %v515_v48 }
  0x36   : > { %575 = vmatpush.msra.mxu1 %v3790_v13  ;;  %661 = vmatpush.msrb.mxu0 %v660_v57  ;;  %v705_v16 = vand.u32 4294901760, %v704_v15 }
  0x37   : > { %614 = vmatpush.msra.mxu2 %v521_v52  ;;  %526 = vmatmul.f32.vlgmr.msrb.gmra.mxu3 %v3821_v44 }
  0x38   : > { %577 = vmatpush.msra.mxu1 %v3809_v40  ;;  %633 = vmatpush.msra.mxu3 %v3788_v12  ;;  %v709_v12 = vand.u32 4294901760, %v708_v11 }
  0x39   : > { %732 = vmatpush.msrb.mxu2 %v690_v61  ;;  %663 = vmatpush.msrb.mxu0 %v662_v62 }
  0x3a   : > { %579 = vmatpush.msra.mxu1 %v478_v45  ;;  %635 = vmatpush.msra.mxu3 %v3790_v13  ;;  %v710_v17 = vsub.f32 %v708_v11, %v709_v12 }
  0x3b   : > { %735 = vmatpush.msrb.mxu2 %v696_v1  ;;  %665 = vmatpush.msrb.mxu0 %v664_v2 }
  0x3c   : > { %556 = vmatmul.f32.vlgmr.msra.gmra.mxu0 %v3825_v47  ;;  %637 = vmatpush.msra.mxu3 %v3809_v40  ;;  %v711_v13 = vand.u32 4294901760, %v710_v17 }
  0x3d   : > { %583 = vmatmul.f32.vlgmr.msra.gmra.mxu1 %v3828_v50  ;;  %738 = vmatpush.msrb.mxu2 %v702_v6  ;;  %v870_v6 = vld [vmem:[%s3763_s7 + $0x8] sm:$0x3] }
  0x3e   : > { %694 = vmatpush.msrb.mxu1 %v693_v8  ;;  %616 = vmatmul.f32.vlgmr.msra.gmra.mxu2 %v3821_v44 }
  0x3f   : > { %667 = vmatpush.msrb.mxu0 %v666_v7  ;;  %639 = vmatpush.msra.mxu3 %v478_v45 }
  0x40   : > { %700 = vmatpush.msrb.mxu1 %v699_v14  ;;  %641 = vmatmul.f32.vlgmr.msra.gmra.mxu3 %v3821_v44 }
  0x41   : > { %741 = vmatpush.msrb.mxu2 %v708_v11  ;;  %761 = vmatpush.msrb.mxu3 %v660_v57  ;;  %v907_v11 = vand.u32 4294901760, %v869_v9 }
  0x42   : > { %706 = vmatpush.msrb.mxu1 %v705_v16  ;;  %790 = vmatpush.msra.mxu0 %v691_v0 }
  0x43   : > { %763 = vmatpush.msrb.mxu3 %v662_v62  ;;  %v939_v15 = vsub.f32 %v869_v9, %v907_v11 }
  0x44   : > { %712 = vmatpush.msrb.mxu1 %v711_v13  ;;  %794 = vmatpush.msra.mxu0 %v697_v5 }
  0x45   : > { %765 = vmatpush.msrb.mxu3 %v664_v2  ;;  %v940_v16 = vand.u32 4294901760, %v939_v15 }
  0x46   : > { %821 = vmatpush.msra.mxu1 %v660_v57  ;;  %798 = vmatpush.msra.mxu0 %v703_v10 }
  0x47   : > { %767 = vmatpush.msrb.mxu3 %v666_v7  ;;  %v941_v13 = vsub.f32 %v939_v15, %v940_v16 }
  0x48   : > { %823 = vmatpush.msra.mxu1 %v662_v62  ;;  %802 = vmatpush.msra.mxu0 %v709_v12 }
  0x4a   : > { %825 = vmatpush.msra.mxu1 %v664_v2 }
  0x4c   : > { %827 = vmatpush.msra.mxu1 %v666_v7  ;;  %v889_v7 = vsel %vm887_vm5, %v870_v6, 0 }
  0x4d   : > { %v905_v8 = vand.u32 4294901760, %v889_v7 }
  0x4f   : > { %v933_v10 = vsub.f32 %v889_v7, %v905_v8  ;;  %906 = vmatpush.msra.mxu2 %v905_v8 }
  0x51   : > { %v934_v14 = vand.u32 4294901760, %v933_v10  ;;  %908 = vmatpush.msra.mxu2 %v907_v11 }
  0x53   : > { %v935_v12 = vsub.f32 %v933_v10, %v934_v14 }
  0x55   : > { %v936_v17 = vand.u32 4294901760, %v935_v12 }
  0x57   : > { %937 = vmatpush.msra.mxu3 %v936_v17 }
  0xa9   : > { %v301_v18 = vpop.f32.mrf.mxu0  ;;  %v337_v19 = vpop.f32.mrf.mxu1 }
  0xaa   : > { %v365_v20 = vpop.f32.mrf.mxu2  ;;  %v338_v21 = vadd.f32 %v337_v19, %v301_v18  ;;  %v942_v18 = vand.u32 4294901760, %v941_v13  ;;  %v872_v19 = vld [vmem:[%s3763_s7 + $0x18] sm:$0x3] }
  0xab   : > { %v391_v22 = vpop.f32.mrf.mxu3 }
  0xac   : > { %v366_v23 = vadd.f32 %v365_v20, %v338_v21  ;;  %v1053_v20 = vsel %vm887_vm5, %v872_v19, 0  ;;  %943 = vmatpush.msra.mxu3 %v942_v18 }
  0xad   : > { %v3889_v21 = vand.u32 4294901760, %v1053_v20 }
  0xae   : > { %v392_v24 = vadd.f32 %v391_v22, %v366_v23  ;;  %v871_v22 = vld [vmem:[%s3763_s7 + $0x10] sm:$0xff] }
  0xaf   : > { %v3894_v23 = vsub.f32 %v1053_v20, %v3889_v21 }
  0xb1   : > { %v421_v25 = vpop.f32.mrf.mxu0 }
  0xb2   : > { %v422_v26 = vadd.f32 %v421_v25, %v392_v24  ;;  %v445_v27 = vpop.f32.mrf.mxu1  ;;  %v3896_v24 = vand.u32 4294901760, %v871_v22  ;;  %v1098_v25 = vand.u32 4294901760, %v3894_v23 }
  0xb3   : > { %v486_v35 = vpop.f32.mrf.mxu2 }
  0xb4   : > { %v446_v28 = vadd.f32 %v445_v27, %v422_v26  ;;  %v3901_v26 = vsub.f32 %v871_v22, %v3896_v24  ;;  %v1099_v27 = vsub.f32 %v3894_v23, %v1098_v25  ;;  %v878_v22 = vld [vmem:[%s3763_s7 + $0x48] sm:$0x3] }
  0xb6   : > { %v646_v29 = vsel %vm456_vm3, %v446_v28, 0  ;;  %v1104_v28 = vand.u32 4294901760, %v3901_v26 }
  0xb7   : > { %v3858_v30 = vand.u32 4294901760, %v646_v29 }
  0xb9   : > { %v3861_v31 = vsub.f32 %v646_v29, %v3858_v30  ;;  %714 = vmatmul.f32.vlgmr.msrb.gmra.mxu1 %v3858_v30  ;;  %v557_v38 = vpop.f32.mrf.mxu0  ;;  %v1100_v29 = vand.u32 4294901760, %v1099_v27 }
  0xba   : > { %v527_v36 = vpop.f32.mrf.mxu3  ;;  %v584_v40 = vpop.f32.mrf.mxu1  ;;  %990 = vmatpush.msrb.mxu1 %v905_v8 }
  0xbb   : > { %744 = vmatmul.f32.vlgmr.msrb.gmra.mxu2 %v3861_v31  ;;  %v3866_v32 = vand.u32 4294901760, %v3861_v31  ;;  %v528_v37 = vadd.f32 %v527_v36, %v486_v35 }
  0xbc   : > { %992 = vmatpush.msrb.mxu1 %v907_v11  ;;  %1017 = vmatpush.msrb.mxu2 %v934_v14 }
  0xbd   : > { %771 = vmatmul.f32.vlgmr.msrb.gmra.mxu3 %v3866_v32  ;;  %v671_v33 = vsub.f32 %v3861_v31, %v3866_v32  ;;  %v558_v39 = vadd.f32 %v557_v38, %v528_v37  ;;  %v874_v37 = vld [vmem:[%s3763_s7 + $0x28] sm:$0x3] }
  0xbe   : > { %1021 = vmatpush.msrb.mxu2 %v940_v16  ;;  %1042 = vmatpush.msrb.mxu3 %v905_v8 }
  0xbf   : > { %v3871_v34 = vand.u32 4294901760, %v671_v33  ;;  %v585_v41 = vadd.f32 %v584_v40, %v558_v39  ;;  %v1105_v33 = vsub.f32 %v3901_v26, %v1104_v28  ;;  %v1217_v40 = vsel %vm887_vm5, %v874_v37, 0 }
  0xc0   : > { %1044 = vmatpush.msrb.mxu3 %v907_v11 }
  0xc1   : > { %673 = vmatmul.f32.vlgmr.msrb.gmra.mxu0 %v3871_v34  ;;  %829 = vmatmul.f32.vlgmr.msra.gmra.mxu1 %v3858_v30  ;;  %v617_v42 = vpop.f32.mrf.mxu2  ;;  %v1106_v36 = vand.u32 4294901760, %v1105_v33 }
  0xc2   : > { %v618_v43 = vadd.f32 %v617_v42, %v585_v41  ;;  %965 = vmatpush.msrb.mxu0 %v933_v10  ;;  %1101 = vmatpush.msra.mxu1 %v1100_v29 }
  0xc3   : > { %v642_v45 = vpop.f32.mrf.mxu3 }
  0xc4   : > { %v643_v46 = vadd.f32 %v642_v45, %v618_v43  ;;  %968 = vmatpush.msrb.mxu0 %v939_v15  ;;  %1107 = vmatpush.msra.mxu1 %v1106_v36  ;;  %v873_v43 = vld [vmem:[%s3763_s7 + $0x20] sm:$0xff] }
  0xc9   : > { %804 = vmatmul.f32.vlgmr.msra.gmra.mxu0 %v3858_v30 }
  0xca   : > { %1070 = vmatpush.msra.mxu0 %v3889_v21 }
  0xcc   : > { %1072 = vmatpush.msra.mxu0 %v3896_v24 }
 0x136   : > { %v715_v48 = vpop.f32.mrf.mxu1 }
 0x13e   : > { %v674_v49 = vpop.f32.mrf.mxu0  ;;  %v745_v53 = vpop.f32.mrf.mxu2 }
 0x13f   : > { %v675_v51 = vadd.f32 %v674_v49, %v643_v46  ;;  %v830_v61 = vpop.f32.mrf.mxu1 }
 0x140   : > { %v772_v55 = vpop.f32.mrf.mxu3 }
 0x141   : > { %v716_v52 = vadd.f32 %v715_v48, %v675_v51  ;;  %v3909_v48 = vand.u32 4294901760, %v1217_v40  ;;  %v3911_v51 = vand.u32 4294901760, %v873_v43 }
 0x143   : > { %v746_v54 = vadd.f32 %v745_v53, %v716_v52 }
 0x145   : > { %v773_v56 = vadd.f32 %v772_v55, %v746_v54  ;;  %v3914_v54 = vsub.f32 %v1217_v40, %v3909_v48 }
 0x146   : > { %v805_v57 = vpop.f32.mrf.mxu0 }
 0x147   : > { %v806_v59 = vadd.f32 %v805_v57, %v773_v56  ;;  %v3920_v57 = vsub.f32 %v873_v43, %v3911_v51 }
 0x149   : > { %v831_v62 = vadd.f32 %v830_v61, %v806_v59  ;;  %v876_v59 = vld [vmem:[%s3763_s7 + $0x38] sm:$0x3] }
 0x14b   : > { %v835_v63 = vadd.f32 %v3630_v60, %v831_v62  ;;  %v1262_v62 = vand.u32 4294901760, %v3914_v54 }
 0x14d   : > { %v837_v0 = vsel %vm836_vm4, %v835_v63, -inf  ;;  %v1263_v6 = vsub.f32 %v3914_v54, %v1262_v62 }
 0x14e   : > { %838 = vmax.xlane.f32.xlu0 %v837_v0  ;;  %v1381_v0 = vsel %vm887_vm5, %v876_v59, 0  ;;  %v879_v59 = vld [vmem:[%s3763_s7 + $0x50] sm:$0xff] }
 0x14f   : > { %v3937_v7 = vand.u32 4294901760, %v1381_v0  ;;  %v1264_v12 = vand.u32 4294901760, %v1263_v6  ;;  %v882_v6 = vld [vmem:[%s3763_s7 + $0x68] sm:$0x3] }
 0x151   : > { %v3951_v16 = vsub.f32 %v1381_v0, %v3937_v7 }
 0x1c1   : > { %v839_v1 = vpop.xlane.xlu0 %838 }
 0x1c2   : > { %v840_v2 = vsub.f32 %v835_v63, %v839_v1 }
 0x1c4   : > { %v841_v3 = vmul.f32 1.442695, %v840_v2  ;;  %v1268_v2 = vand.u32 4294901760, %v3920_v57 }
 0x1c6   : > { %3635 = vpow2.f32 %v841_v3  ;;  %v1269_v10 = vsub.f32 %v3920_v57, %v1268_v2 }
 0x1c8   : > { %v1270_v18 = vand.u32 4294901760, %v1269_v10  ;;  %v1873_v10 = vsel %vm887_vm5, %v882_v6, 0 }
 0x1cc   : > { %v3880_v4 = vpop.eup %3635 }
 0x1cd   : > { %v843_v5 = vsel %vm836_vm4, %v3880_v4, 0.0 }
 0x1ce   : > { %844 = vadd.xlane.f32.xlu0 %v843_v5  ;;  %v875_v5 = vld [vmem:[%s3763_s7 + $0x30] sm:$0xff] }
 0x1cf   : > { %v3946_v11 = vand.u32 4294901760, %v875_v5 }
 0x1d1   : > { %v3957_v20 = vsub.f32 %v875_v5, %v3946_v11 }
 0x1d3   : > { %v1432_v29 = vand.u32 4294901760, %v3957_v20 }
 0x241   : > { %v845_v35 = vpop.xlane.xlu0 %844 }
 0x242   : > { %3637 = vrcp.f32 %v845_v35  ;;  %v857_v42 = vand.u32 2147483648, %v845_v35  ;;  %v855_v46 = vand.u32 2147483647, %v845_v35  ;;  %vm851_vm7 = vweird.f32 %v845_v35 }
 0x244   : > { %v858_v52 = vor.u32 1.1754944e-38, %v857_v42  ;;  %vm856_vm9 = vcmp.eq.f32.partialorder %v855_v46, 8.507059e+37  ;;  %v880_v46 = vld [vmem:[%s3763_s7 + $0x58] sm:$0x3] }
 0x248   : > { %v3638_v38 = vpop.eup %3637 }
 0x249   : > { %v847_v39 = vmul.f32 %v3638_v38, %v845_v35  ;;  %vm852_vm6 = vweird.f32 %v3638_v38 }
 0x24a   : > { %vm853_vm8 = vmor %vm851_vm7, %vm852_vm6 }
 0x24b   : > { %v848_v41 = vsub.f32 1.0, %v847_v39 }
 0x24d   : > { %v849_v45 = vmul.f32 %v3638_v38, %v848_v41 }
 0x24f   : > { %v850_v49 = vadd.f32 %v3638_v38, %v849_v45 }
 0x251   : > { %v854_v53 = vsel %vm853_vm8, %v3638_v38, %v850_v49 }
 0x252   : > { %v859_v55 = vsel %vm856_vm9, %v858_v52, %v854_v53  ;;  %vm3451_vm9 = vcmask 425120  }
 0x253   : > { %v3917_v56 = vmul.f32 %v3880_v4, %v859_v55 }
 0x255   : > { %v885_v60 = vsel %vm836_vm4, %v3917_v56, 0  ;;  %v862_v61 = vrot.slane %v3917_v56, 1  ;;  %v863_v19 = vrot.slane %v3917_v56, 2  ;;  %v864_v27 = vrot.slane %v3917_v56, 3 }
 0x256   : > { %v909_v63 = vand.u32 4294901760, %v885_v60 }
 0x257   : > { %v1050_v1 = vsel %vm836_vm4, %v862_v61, 0  ;;  %v1378_v35 = vsel %vm836_vm4, %v864_v27, 0 }
 0x258   : > { %945 = vmatmul.f32.vlgmr.msra.gmra.mxu3 %v909_v63  ;;  %v910_v3 = vsub.f32 %v885_v60, %v909_v63  ;;  %v3930_v4 = vand.u32 4294901760, %v1050_v1  ;;  %v3982_v39 = vand.u32 4294901760, %v1378_v35 }
 0x259   : > { %1154 = vmatpush.msra.mxu3 %v3889_v21 }
 0x25a   : > { %971 = vmatmul.f32.vlgmr.msrb.gmra.mxu0 %v910_v3  ;;  %v911_v8 = vand.u32 4294901760, %v910_v3  ;;  %v3940_v9 = vsub.f32 %v1050_v1, %v3930_v4 }
 0x25b   : > { %1156 = vmatpush.msra.mxu3 %v3896_v24  ;;  %1181 = vmatpush.msrb.mxu0 %v1098_v25  ;;  %v1426_v25 = vand.u32 4294901760, %v3951_v16 }
 0x25c   : > { %996 = vmatmul.f32.vlgmr.msrb.gmra.mxu1 %v911_v8  ;;  %v912_v14 = vsub.f32 %v910_v3, %v911_v8  ;;  %v1075_v15 = vand.u32 4294901760, %v3940_v9 }
 0x25d   : > { %1185 = vmatpush.msrb.mxu0 %v1104_v28  ;;  %1206 = vmatpush.msrb.mxu1 %v3889_v21  ;;  %v1214_v28 = vsel %vm836_vm4, %v863_v19, 0  ;;  %v1427_v33 = vsub.f32 %v3951_v16, %v1426_v25 }
 0x25e   : > { %v913_v17 = vand.u32 4294901760, %v912_v14  ;;  %v1076_v13 = vsub.f32 %v3940_v9, %v1075_v15  ;;  %v3975_v37 = vand.u32 4294901760, %v1214_v28 }
 0x25f   : > { %1208 = vmatpush.msrb.mxu1 %v3896_v24  ;;  %v1545_v24 = vsel %vm887_vm5, %v878_v22, 0  ;;  %v1428_v40 = vand.u32 4294901760, %v1427_v33 }
 0x260   : > { %914 = vmatmul.f32.vlgmr.msra.gmra.mxu2 %v913_v17  ;;  %1046 = vmatmul.f32.vlgmr.msrb.gmra.mxu3 %v909_v63  ;;  %v1077_v21 = vand.u32 4294901760, %v1076_v13  ;;  %v3973_v36 = vand.u32 4294901760, %v1545_v24  ;;  %v1238_v42 = vsub.f32 %v1214_v28, %v3975_v37  ;;  %v4051_v17 = vand.u32 4294901760, %v1873_v10 }
 0x261   : > { %1129 = vmatpush.msra.mxu2 %v3894_v23  ;;  %1265 = vmatpush.msrb.mxu3 %v1264_v12  ;;  %v877_v23 = vld [vmem:[%s3763_s7 + $0x40] sm:$0xff] }
 0x262   : > { %1078 = vmatmul.f32.vlgmr.msra.gmra.mxu0 %v1077_v21  ;;  %v3980_v38 = vand.u32 4294901760, %v877_v23  ;;  %v3987_v41 = vsub.f32 %v1545_v24, %v3973_v36  ;;  %v1239_v52 = vand.u32 4294901760, %v1238_v42  ;;  %v4066_v21 = vsub.f32 %v1873_v10, %v4051_v17 }
 0x263   : > { %1132 = vmatpush.msra.mxu2 %v3901_v26  ;;  %1271 = vmatpush.msrb.mxu3 %v1270_v18  ;;  %v1433_v26 = vsub.f32 %v3957_v20, %v1432_v29 }
 0x264   : > { %1109 = vmatmul.f32.vlgmr.msra.gmra.mxu1 %v3930_v4  ;;  %1293 = vmatpush.msra.mxu0 %v3914_v54  ;;  %v3994_v45 = vsub.f32 %v877_v23, %v3980_v38  ;;  %v1590_v49 = vand.u32 4294901760, %v3987_v41  ;;  %v1918_v23 = vand.u32 4294901760, %v4066_v21 }
 0x265   : > { %1318 = vmatpush.msra.mxu1 %v3909_v48  ;;  %v1434_v43 = vand.u32 4294901760, %v1433_v26  ;;  %v883_v26 = vld [vmem:[%s3763_s7 + $0x70] sm:$0xff] }
 0x266   : > { %1296 = vmatpush.msra.mxu0 %v3920_v57  ;;  %v1596_v53 = vand.u32 4294901760, %v3994_v45  ;;  %v1591_v60 = vsub.f32 %v3987_v41, %v1590_v49 }
 0x267   : > { %1320 = vmatpush.msra.mxu1 %v3911_v51 }
 0x268   : > { %1023 = vmatmul.f32.vlgmr.msrb.gmra.mxu2 %v909_v63  ;;  %1160 = vmatmul.f32.vlgmr.msra.gmra.mxu3 %v1075_v15  ;;  %v1240_v63 = vsub.f32 %v1238_v42, %v1239_v52  ;;  %v1597_v54 = vsub.f32 %v3994_v45, %v1596_v53  ;;  %v1592_v1 = vand.u32 4294901760, %v1591_v60  ;;  %v881_v15 = vld [vmem:[%s3763_s7 + $0x60] sm:$0xff] }
 0x269   : > { %1234 = vmatpush.msrb.mxu2 %v3909_v48  ;;  %1370 = vmatpush.msra.mxu3 %v3909_v48  ;;  %v4000_v48 = vsub.f32 %v1378_v35, %v3982_v39  ;;  %v4058_v19 = vand.u32 4294901760, %v881_v15 }
 0x26a   : > { %1187 = vmatmul.f32.vlgmr.msrb.gmra.mxu0 %v3930_v4  ;;  %v1241_v57 = vand.u32 4294901760, %v1240_v63 }
 0x26b   : > { %1236 = vmatpush.msrb.mxu2 %v3911_v51  ;;  %1372 = vmatpush.msra.mxu3 %v3911_v51  ;;  %v1709_v51 = vsel %vm887_vm5, %v880_v46, 0  ;;  %v1403_v55 = vand.u32 4294901760, %v4000_v48  ;;  %v4073_v24 = vsub.f32 %v881_v15, %v4058_v19 }
 0x26c   : > { %1210 = vmatmul.f32.vlgmr.msrb.gmra.mxu1 %v3930_v4  ;;  %1398 = vmatpush.msrb.mxu0 %v3937_v7  ;;  %v4016_v61 = vand.u32 4294901760, %v1709_v51  ;;  %v865_v4 = vrot.slane %v3917_v56, 4 }
 0x26d   : > { %1429 = vmatpush.msrb.mxu1 %v1428_v40  ;;  %v1404_v0 = vsub.f32 %v4000_v48, %v1403_v55 }
 0x26e   : > { %1400 = vmatpush.msrb.mxu0 %v3946_v11  ;;  %v4029_v3 = vsub.f32 %v1709_v51, %v4016_v61 }
 0x26f   : > { %1435 = vmatpush.msrb.mxu1 %v1434_v43 }
 0x270   : > { %1135 = vmatmul.f32.vlgmr.msra.gmra.mxu2 %v3940_v9  ;;  %1273 = vmatmul.f32.vlgmr.msrb.gmra.mxu3 %v3975_v37  ;;  %v1754_v8 = vand.u32 4294901760, %v4029_v3  ;;  %v866_v9 = vrot.slane %v3917_v56, 5 }
 0x271   : > { %1345 = vmatpush.msra.mxu2 %v1262_v62  ;;  %1482 = vmatpush.msrb.mxu3 %v3937_v7  ;;  %v4024_v62 = vand.u32 4294901760, %v879_v59 }
 0x272   : > { %1299 = vmatmul.f32.vlgmr.msra.gmra.mxu0 %v1238_v42  ;;  %v1755_v12 = vsub.f32 %v4029_v3, %v1754_v8  ;;  %v4103_v42 = vand.u32 4294901760, %v883_v26 }
 0x273   : > { %1349 = vmatpush.msra.mxu2 %v1268_v2  ;;  %1484 = vmatpush.msrb.mxu3 %v3946_v11  ;;  %v1598_v2 = vand.u32 4294901760, %v1597_v54  ;;  %v4034_v5 = vsub.f32 %v879_v59, %v4024_v62  ;;  %v868_v59 = vrot.slane %v3917_v56, 7 }
 0x274   : > { %1324 = vmatmul.f32.vlgmr.msra.gmra.mxu1 %v1239_v52  ;;  %1509 = vmatpush.msra.mxu0 %v1426_v25  ;;  %v1756_v22 = vand.u32 4294901760, %v1755_v12  ;;  %v867_v52 = vrot.slane %v3917_v56, 6  ;;  %v2087_v51 = vsub.f32 %v883_v26, %v4103_v42 }
 0x275   : > { %1534 = vmatpush.msra.mxu1 %v3937_v7  ;;  %v1405_v7 = vand.u32 4294901760, %v1404_v0  ;;  %v1760_v14 = vand.u32 4294901760, %v4034_v5  ;;  %v2034_v54 = vsel %vm836_vm4, %v868_v59, 0 }
 0x276   : > { %1513 = vmatpush.msra.mxu0 %v1432_v29  ;;  %v884_v29 = vld [vmem:[%s3763_s7 + $0x78] sm:$0x3]  ;;  %v1870_v60 = vsel %vm836_vm4, %v867_v52, 0  ;;  %s3694_s7 = smov 52  }
 0x277   : > { %1536 = vmatpush.msra.mxu1 %v3946_v11  ;;  %v1542_v11 = vsel %vm836_vm4, %v865_v4, 0  ;;  %v1761_v18 = vsub.f32 %v4034_v5, %v1760_v14  ;;  %v2037_v35 = vsel %vm887_vm5, %v884_v29, 0 }
 0x278   : > { %1242 = vmatmul.f32.vlgmr.msrb.gmra.mxu2 %v1241_v57  ;;  %1374 = vmatmul.f32.vlgmr.msra.gmra.mxu3 %v3975_v37  ;;  %v4053_v13 = vand.u32 4294901760, %v1542_v11 }
 0x279   : > { %1457 = vmatpush.msrb.mxu2 %v3951_v16  ;;  %1593 = vmatpush.msra.mxu3 %v1592_v1  ;;  %v1706_v16 = vsel %vm836_vm4, %v866_v9, 0  ;;  %v1762_v27 = vand.u32 4294901760, %v1761_v18  ;;  %v2057_v1 = vand.u32 4294901760, %v2034_v54 }
 0x27a   : > { %1406 = vmatmul.f32.vlgmr.msrb.gmra.mxu0 %v1405_v7  ;;  %v1566_v25 = vsub.f32 %v1542_v11, %v4053_v13 }
 0x27b   : > { %1460 = vmatpush.msrb.mxu2 %v3957_v20  ;;  %1599 = vmatpush.msra.mxu3 %v1598_v2  ;;  %v4061_v20 = vand.u32 4294901760, %v1706_v16  ;;  %v2058_v4 = vsub.f32 %v2034_v54, %v2057_v1 }
 0x27c   : > { %1437 = vmatmul.f32.vlgmr.msrb.gmra.mxu1 %v3982_v39  ;;  %1621 = vmatpush.msrb.mxu0 %v3987_v41  ;;  %v1567_v33 = vand.u32 4294901760, %v1566_v25 }
 0x27d   : > { %1646 = vmatpush.msrb.mxu1 %v3973_v36  ;;  %v4078_v28 = vsub.f32 %v1706_v16, %v4061_v20  ;;  %v2059_v6 = vand.u32 4294901760, %v2058_v4 }
 0x27e   : > { %1624 = vmatpush.msrb.mxu0 %v3994_v45  ;;  %v1568_v40 = vsub.f32 %v1566_v25, %v1567_v33 }
 0x27f   : > { %1648 = vmatpush.msrb.mxu1 %v3980_v38 }
 0x280   : > { %1351 = vmatmul.f32.vlgmr.msra.gmra.mxu2 %v3975_v37  ;;  %1488 = vmatmul.f32.vlgmr.msrb.gmra.mxu3 %v1403_v55  ;;  %v1731_v37 = vand.u32 4294901760, %v4078_v28  ;;  %v1569_v45 = vand.u32 4294901760, %v1568_v40 }
 0x281   : > { %1562 = vmatpush.msra.mxu2 %v3973_v36  ;;  %1698 = vmatpush.msrb.mxu3 %v3973_v36  ;;  %v1924_v36 = vand.u32 4294901760, %v4073_v24 }
 0x282   : > { %1515 = vmatmul.f32.vlgmr.msra.gmra.mxu0 %v3982_v39  ;;  %v1732_v43 = vsub.f32 %v4078_v28, %v1731_v37 }
 0x283   : > { %1564 = vmatpush.msra.mxu2 %v3980_v38  ;;  %1700 = vmatpush.msrb.mxu3 %v3980_v38  ;;  %v1919_v38 = vsub.f32 %v4066_v21, %v1918_v23  ;;  %v1925_v41 = vsub.f32 %v4073_v24, %v1924_v36 }
 0x284   : > { %1538 = vmatmul.f32.vlgmr.msra.gmra.mxu1 %v3982_v39  ;;  %1726 = vmatpush.msra.mxu0 %v4016_v61  ;;  %v4095_v39 = vand.u32 4294901760, %v2037_v35 }
 0x285   : > { %1757 = vmatpush.msra.mxu1 %v1756_v22  ;;  %v1920_v46 = vand.u32 4294901760, %v1919_v38 }
 0x286   : > { %1728 = vmatpush.msra.mxu0 %v4024_v62 }
 0x287   : > { %1763 = vmatpush.msra.mxu1 %v1762_v27 }
 0x288   : > { %1463 = vmatmul.f32.vlgmr.msrb.gmra.mxu2 %v4000_v48  ;;  %1601 = vmatmul.f32.vlgmr.msra.gmra.mxu3 %v4053_v13  ;;  %v4108_v48 = vsub.f32 %v2037_v35, %v4095_v39 }
 0x289   : > { %1673 = vmatpush.msrb.mxu2 %v1590_v49  ;;  %1810 = vmatpush.msra.mxu3 %v4016_v61  ;;  %v1926_v49 = vand.u32 4294901760, %v1925_v41 }
 0x28a   : > { %1627 = vmatmul.f32.vlgmr.msrb.gmra.mxu0 %v1566_v25  ;;  %v2082_v55 = vand.u32 4294901760, %v4108_v48 }
 0x28b   : > { %1677 = vmatpush.msrb.mxu2 %v1596_v53  ;;  %1812 = vmatpush.msra.mxu3 %v4024_v62  ;;  %v1733_v53 = vand.u32 4294901760, %v1732_v43 }
 0x28c   : > { %1652 = vmatmul.f32.vlgmr.msrb.gmra.mxu1 %v1567_v33  ;;  %1837 = vmatpush.msrb.mxu0 %v1754_v8  ;;  %v2083_v63 = vsub.f32 %v4108_v48, %v2082_v55  ;;  %v2060_v8 = vsub.f32 %v2058_v4, %v2059_v6 }
 0x28d   : > { %1862 = vmatpush.msrb.mxu1 %v4016_v61  ;;  %v2088_v61 = vand.u32 4294901760, %v2087_v51 }
 0x28e   : > { %1841 = vmatpush.msrb.mxu0 %v1760_v14  ;;  %v2061_v10 = vand.u32 4294901760, %v2060_v8 }
 0x28f   : > { %1864 = vmatpush.msrb.mxu1 %v4024_v62  ;;  %v1893_v62 = vand.u32 4294901760, %v1870_v60  ;;  %v2089_v0 = vsub.f32 %v2087_v51, %v2088_v61 }
 0x290   : > { %1570 = vmatmul.f32.vlgmr.msra.gmra.mxu2 %v1569_v45  ;;  %1702 = vmatmul.f32.vlgmr.msrb.gmra.mxu3 %v4053_v13 }
 0x291   : > { %1785 = vmatpush.msra.mxu2 %v4029_v3  ;;  %1921 = vmatpush.msrb.mxu3 %v1920_v46  ;;  %v2084_v3 = vand.u32 4294901760, %v2083_v63  ;;  %v1894_v57 = vsub.f32 %v1870_v60, %v1893_v62  ;;  %v2090_v2 = vand.u32 4294901760, %v2089_v0 }
 0x292   : > { %1734 = vmatmul.f32.vlgmr.msra.gmra.mxu0 %v1733_v53 }
 0x293   : > { %1788 = vmatpush.msra.mxu2 %v4034_v5  ;;  %1927 = vmatpush.msrb.mxu3 %v1926_v49  ;;  %v1895_v5 = vand.u32 4294901760, %v1894_v57 }
 0x294   : > { %1765 = vmatmul.f32.vlgmr.msra.gmra.mxu1 %v4061_v20  ;;  %1949 = vmatpush.msra.mxu0 %v4066_v21 }
 0x295   : > { %1974 = vmatpush.msra.mxu1 %v4051_v17  ;;  %v1896_v7 = vsub.f32 %v1894_v57, %v1895_v5 }
 0x296   : > { %1952 = vmatpush.msra.mxu0 %v4073_v24 }
 0x297   : > { %1976 = vmatpush.msra.mxu1 %v4058_v19  ;;  %v1897_v9 = vand.u32 4294901760, %v1896_v7 }
 0x298   : > { %1679 = vmatmul.f32.vlgmr.msrb.gmra.mxu2 %v4053_v13  ;;  %1816 = vmatmul.f32.vlgmr.msra.gmra.mxu3 %v1731_v37 }
 0x299   : > { %1890 = vmatpush.msrb.mxu2 %v4051_v17  ;;  %2026 = vmatpush.msra.mxu3 %v4051_v17 }
 0x29a   : > { %1843 = vmatmul.f32.vlgmr.msrb.gmra.mxu0 %v4061_v20 }
 0x29b   : > { %1892 = vmatpush.msrb.mxu2 %v4058_v19  ;;  %2028 = vmatpush.msra.mxu3 %v4058_v19 }
 0x29c   : > { %1866 = vmatmul.f32.vlgmr.msrb.gmra.mxu1 %v4061_v20  ;;  %2054 = vmatpush.msrb.mxu0 %v4095_v39 }
 0x29d   : > { %2085 = vmatpush.msrb.mxu1 %v2084_v3 }
 0x29e   : > { %2056 = vmatpush.msrb.mxu0 %v4103_v42 }
 0x29f   : > { %2091 = vmatpush.msrb.mxu1 %v2090_v2 }
 0x2a0   : > { %1791 = vmatmul.f32.vlgmr.msra.gmra.mxu2 %v4078_v28  ;;  %1929 = vmatmul.f32.vlgmr.msrb.gmra.mxu3 %v1893_v62 }
 0x2a1   : > { %2001 = vmatpush.msra.mxu2 %v1918_v23  ;;  %2138 = vmatpush.msrb.mxu3 %v4095_v39 }
 0x2a2   : > { %1955 = vmatmul.f32.vlgmr.msra.gmra.mxu0 %v1894_v57 }
 0x2a3   : > { %2005 = vmatpush.msra.mxu2 %v1924_v36  ;;  %2140 = vmatpush.msrb.mxu3 %v4103_v42 }
 0x2a4   : > { %1980 = vmatmul.f32.vlgmr.msra.gmra.mxu1 %v1895_v5  ;;  %2165 = vmatpush.msra.mxu0 %v2082_v55  ;;  %v2204_v5 = vld [vmem:[%s4481_s3 + $0x88] sm:$0xff] }
 0x2a5   : > { %2190 = vmatpush.msra.mxu1 %v4095_v39  ;;  %v4186_v8 = vand.u32 4294901760, %v2204_v5 }
 0x2a6   : > { %2169 = vmatpush.msra.mxu0 %v2088_v61 }
 0x2a7   : > { %2192 = vmatpush.msra.mxu1 %v4103_v42 }
 0x2a8   : > { %1898 = vmatmul.f32.vlgmr.msrb.gmra.mxu2 %v1897_v9  ;;  %2030 = vmatmul.f32.vlgmr.msra.gmra.mxu3 %v1893_v62 }
 0x2a9   : > { %2113 = vmatpush.msrb.mxu2 %v4108_v48 }
 0x2aa   : > { %2062 = vmatmul.f32.vlgmr.msrb.gmra.mxu0 %v2061_v10  ;;  %v2202_v10 = vld [vmem:[%s4481_s3 + $0x78] sm:$0xff] }
 0x2ab   : > { %2116 = vmatpush.msrb.mxu2 %v2087_v51 }
 0x2ac   : > { %2093 = vmatmul.f32.vlgmr.msrb.gmra.mxu1 %v2057_v1 }
 0x2b0   : > { %2007 = vmatmul.f32.vlgmr.msra.gmra.mxu2 %v1893_v62  ;;  %2144 = vmatmul.f32.vlgmr.msrb.gmra.mxu3 %v2059_v6  ;;  %v2203_v6 = vld [vmem:[%s4481_s3 + $0x80] sm:$0xff] }
 0x2b1   : > { %v4188_v9 = vand.u32 4294901760, %v2203_v6 }
 0x2b2   : > { %2171 = vmatmul.f32.vlgmr.msra.gmra.mxu0 %v2057_v1 }
 0x2b4   : > { %2194 = vmatmul.f32.vlgmr.msra.gmra.mxu1 %v2057_v1 }
 0x2b8   : > { %2119 = vmatmul.f32.vlgmr.msrb.gmra.mxu2 %v2058_v4  ;;  %v2205_v4 = vld [vmem:[%s4481_s3 + $0x90] sm:$0xff] }
 0x2b9   : > { %v4184_v7 = vand.u32 4294901760, %v2205_v4 }
 0x2bb   : > { %2350 = vmatpush.msrb.mxu1 %v4184_v7  ;;  %2250 = vmatpush.msra.mxu2 %v4184_v7 }
 0x2bd   : > { %2352 = vmatpush.msrb.mxu1 %v4186_v8  ;;  %2252 = vmatpush.msra.mxu2 %v4186_v8 }
 0x2bf   : > { %2354 = vmatpush.msrb.mxu1 %v4188_v9  ;;  %2254 = vmatpush.msra.mxu2 %v4188_v9 }
 0x2d7   : > { %v972_v11 = vpop.f32.mrf.mxu0 }
 0x2d9   : > { %v997_v14 = vpop.f32.mrf.mxu1 }
 0x2db   : > { %v946_v15 = vpop.f32.mrf.mxu3 }
 0x2df   : > { %v1079_v12 = vpop.f32.mrf.mxu0 }
 0x2e1   : > { %v1110_v16 = vpop.f32.mrf.mxu1 }
 0x2e2   : > { %v1111_v17 = vadd.f32 %v1110_v16, %v1079_v12  ;;  %v4198_v12 = vsub.f32 %v2203_v6, %v4188_v9 }
 0x2e3   : > { %v915_v13 = vpop.f32.mrf.mxu2  ;;  %v1047_v18 = vpop.f32.mrf.mxu3 }
 0x2e4   : > { %v947_v19 = vadd.f32 %v946_v15, %v915_v13  ;;  %v2285_v15 = vsub.f32 %v2204_v5, %v4186_v8 }
 0x2e6   : > { %v973_v20 = vadd.f32 %v972_v11, %v947_v19  ;;  %v4193_v11 = vand.u32 4294901760, %v2202_v10  ;;  %v2292_v19 = vand.u32 4294901760, %v4198_v12 }
 0x2e7   : > { %v1188_v22 = vpop.f32.mrf.mxu0 }
 0x2e8   : > { %v998_v21 = vadd.f32 %v997_v14, %v973_v20  ;;  %v2279_v14 = vsub.f32 %v2205_v4, %v4184_v7  ;;  %v4203_v16 = vsub.f32 %v2202_v10, %v4193_v11  ;;  %2356 = vmatpush.msrb.mxu1 %v4193_v11  ;;  %2256 = vmatpush.msra.mxu2 %v4193_v11  ;;  %v2199_v4 = vld [vmem:[%s4481_s3 + $0x60] sm:$0xff] }
 0x2e9   : > { %v1211_v25 = vpop.f32.mrf.mxu1 }
 0x2ea   : > { %v2280_v13 = vand.u32 4294901760, %v2279_v14  ;;  %2321 = vmatpush.msrb.mxu0 %v2279_v14 }
 0x2eb   : > { %v1024_v27 = vpop.f32.mrf.mxu2  ;;  %v1161_v24 = vpop.f32.mrf.mxu3 }
 0x2ec   : > { %v1025_v28 = vadd.f32 %v1024_v27, %v998_v21  ;;  %v2281_v27 = vsub.f32 %v2279_v14, %v2280_v13  ;;  %2324 = vmatpush.msrb.mxu0 %v2285_v15  ;;  %2379 = vmatpush.msrb.mxu2 %v2280_v13 }
 0x2ee   : > { %v1048_v29 = vadd.f32 %v1047_v18, %v1025_v28  ;;  %v2286_v18 = vand.u32 4294901760, %v2285_v15  ;;  %v2293_v28 = vsub.f32 %v4198_v12, %v2292_v19  ;;  %2327 = vmatpush.msrb.mxu0 %v4198_v12 }
 0x2ef   : > { %v4145_v23 = vpop.f32.mrf.mxu0 }
 0x2f0   : > { %v2294_v5 = vand.u32 4294901760, %v2293_v28  ;;  %2330 = vmatpush.msrb.mxu0 %v4203_v16  ;;  %2383 = vmatpush.msrb.mxu2 %v2286_v18 }
 0x2f1   : > { %v4147_v33 = vpop.f32.mrf.mxu1 }
 0x2f2   : > { %2387 = vmatpush.msrb.mxu2 %v2292_v19 }
 0x2f3   : > { %v1136_v35 = vpop.f32.mrf.mxu2  ;;  %v1274_v36 = vpop.f32.mrf.mxu3 }
 0x2f4   : > { %v1137_v37 = vadd.f32 %v1136_v35, %v1111_v17 }
 0x2f6   : > { %v1162_v26 = vadd.f32 %v1161_v24, %v1137_v37  ;;  %v2287_v24 = vsub.f32 %v2285_v15, %v2286_v18  ;;  %v2201_v37 = vld [vmem:[%s4481_s3 + $0x70] sm:$0xff] }
 0x2f7   : > { %v1407_v39 = vpop.f32.mrf.mxu0 }
 0x2f8   : > { %v1189_v38 = vadd.f32 %v1188_v22, %v1162_v26  ;;  %v2298_v22 = vand.u32 4294901760, %v4203_v16  ;;  %v2282_v26 = vand.u32 4294901760, %v2281_v27 }
 0x2f9   : > { %v1438_v41 = vpop.f32.mrf.mxu1 }
 0x2fa   : > { %v1212_v40 = vadd.f32 %v1211_v25, %v1189_v38  ;;  %v2288_v38 = vand.u32 4294901760, %v2287_v24  ;;  %2283 = vmatpush.msra.mxu3 %v2282_v26  ;;  %2391 = vmatpush.msrb.mxu2 %v2298_v22 }
 0x2fb   : > { %v1243_v42 = vpop.f32.mrf.mxu2  ;;  %v4149_v43 = vpop.f32.mrf.mxu3 }
 0x2fc   : > { %v2214_v46 = vrot.slane %v1212_v40, 7  ;;  %v1275_v20 = vadd.f32 %v1274_v36, %v1243_v42  ;;  %v2299_v40 = vsub.f32 %v4203_v16, %v2298_v22  ;;  %v4220_v42 = vand.u32 4294901760, %v2201_v37  ;;  %2289 = vmatpush.msra.mxu3 %v2288_v38 }
 0x2fe   : > { %v4151_v48 = vsel %vm2215_vm10, %v2214_v46, %v1048_v29  ;;  %v1439_v29 = vadd.f32 %v1438_v41, %v1407_v39  ;;  %v1301_v39 = vadd.f32 %v4145_v23, %v1275_v20  ;;  %v4232_v6 = vsub.f32 %v2201_v37, %v4220_v42  ;;  %2435 = vmatpush.msra.mxu0 %v4220_v42 }
 0x2ff   : > { %v4153_v45 = vpop.f32.mrf.mxu0  ;;  %v2300_v10 = vand.u32 4294901760, %v2299_v40  ;;  %2295 = vmatpush.msra.mxu3 %v2294_v5  ;;  %vm3456_vm10 = vcmask 507296  }
 0x300   : > { %v2465_v14 = vand.u32 4294901760, %v4232_v6  ;;  %v1326_v12 = vadd.f32 %v4147_v33, %v1301_v39 }
 0x301   : > { %v4159_v51 = vpop.f32.mrf.mxu1  ;;  %2301 = vmatpush.msra.mxu3 %v2300_v10 }
 0x302   : > { %v2466_v33 = vsub.f32 %v4232_v6, %v2465_v14 }
 0x303   : > { %v4155_v49 = vpop.f32.mrf.mxu2  ;;  %v4157_v52 = vpop.f32.mrf.mxu3  ;;  %2410 = vmatpush.msrb.mxu3 %v4184_v7 }
 0x304   : > { %v1353_v24 = vadd.f32 %v4155_v49, %v1326_v12 }
 0x305   : > { %2412 = vmatpush.msrb.mxu3 %v4186_v8 }
 0x307   : > { %v4161_v59 = vpop.f32.mrf.mxu0  ;;  %2414 = vmatpush.msrb.mxu3 %v4188_v9 }
 0x309   : > { %v4163_v60 = vpop.f32.mrf.mxu1  ;;  %2416 = vmatpush.msrb.mxu3 %v4193_v11 }
 0x30b   : > { %v1464_v53 = vpop.f32.mrf.mxu2  ;;  %v1602_v55 = vpop.f32.mrf.mxu3 }
 0x30c   : > { %v1465_v41 = vadd.f32 %v1464_v53, %v1439_v29  ;;  %v4236_v53 = vand.u32 4294901760, %v2199_v4 }
 0x30e   : > { %v4251_v13 = vsub.f32 %v2199_v4, %v4236_v53 }
 0x30f   : > { %v1735_v54 = vpop.f32.mrf.mxu0 }
 0x310   : > { %v2477_v18 = vand.u32 4294901760, %v4251_v13 }
 0x311   : > { %v1766_v62 = vpop.f32.mrf.mxu1 }
 0x312   : > { %v1767_v46 = vadd.f32 %v1766_v62, %v1735_v54 }
 0x313   : > { %v1571_v61 = vpop.f32.mrf.mxu2  ;;  %v4165_v63 = vpop.f32.mrf.mxu3 }
 0x314   : > { %v1603_v35 = vadd.f32 %v1602_v55, %v1571_v61  ;;  %v2200_v61 = vld [vmem:[%s4481_s3 + $0x68] sm:$0xff] }
 0x315   : > { %v4234_v23 = vand.u32 4294901760, %v2200_v61 }
 0x316   : > { %v1629_v62 = vadd.f32 %v4161_v59, %v1603_v35  ;;  %v2467_v35 = vand.u32 4294901760, %v2466_v33 }
 0x317   : > { %v4171_v3 = vpop.f32.mrf.mxu0  ;;  %v4242_v15 = vsub.f32 %v2200_v61, %v4234_v23  ;;  %2437 = vmatpush.msra.mxu0 %v4234_v23 }
 0x318   : > { %2468 = vmatpush.msra.mxu1 %v2467_v35 }
 0x319   : > { %v4173_v57 = vpop.f32.mrf.mxu1  ;;  %2439 = vmatpush.msra.mxu0 %v4236_v53 }
 0x31b   : > { %v4167_v0 = vpop.f32.mrf.mxu2  ;;  %v4169_v1 = vpop.f32.mrf.mxu3 }
 0x31f   : > { %v1956_v21 = vpop.f32.mrf.mxu0 }
 0x321   : > { %v1981_v36 = vpop.f32.mrf.mxu1 }
 0x323   : > { %v1792_v2 = vpop.f32.mrf.mxu2  ;;  %v1930_v17 = vpop.f32.mrf.mxu3 }
 0x324   : > { %v1793_v54 = vadd.f32 %v1792_v2, %v1767_v46  ;;  %v2198_v2 = vld [vmem:[%s4481_s3 + $0x58] sm:$0xff] }
 0x325   : > { %v4257_v27 = vand.u32 4294901760, %v2198_v2 }
 0x326   : > { %v1818_v28 = vadd.f32 %v4169_v1, %v1793_v54 }
 0x327   : > { %v2063_v29 = vpop.f32.mrf.mxu0  ;;  %v4268_v26 = vsub.f32 %v2198_v2, %v4257_v27  ;;  %2441 = vmatpush.msra.mxu0 %v4257_v27 }
 0x329   : > { %v2094_v19 = vpop.f32.mrf.mxu1  ;;  %v2483_v39 = vand.u32 4294901760, %v4268_v26 }
 0x32b   : > { %v1899_v25 = vpop.f32.mrf.mxu2  ;;  %v2031_v20 = vpop.f32.mrf.mxu3 }
 0x32c   : > { %v1931_v55 = vadd.f32 %v1930_v17, %v1899_v25  ;;  %v1490_v17 = vadd.f32 %v4157_v52, %v1465_v41  ;;  %v2471_v52 = vand.u32 4294901760, %v4242_v15  ;;  %v1376_v41 = vadd.f32 %v4149_v43, %v1353_v24 }
 0x32e   : > { %v1957_v59 = vadd.f32 %v1956_v21, %v1931_v55  ;;  %v1654_v21 = vadd.f32 %v4163_v60, %v1629_v62  ;;  %v2472_v37 = vsub.f32 %v4242_v15, %v2471_v52  ;;  %v1517_v49 = vadd.f32 %v4153_v45, %v1490_v17 }
 0x32f   : > { %v2478_v60 = vsub.f32 %v4251_v13, %v2477_v18  ;;  %v1845_v45 = vadd.f32 %v4171_v3, %v1818_v28  ;;  %v2095_v55 = vadd.f32 %v2094_v19, %v2063_v29  ;;  %v2217_v43 = vrot.slane %v1376_v41, 6  ;;  %v2172_v9 = vpop.f32.mrf.mxu0  ;;  %v2612_v41 = vld [vmem:[%s4481_s3 + $0xa0] sm:$0xff] }
 0x330   : > { %v1681_v1 = vadd.f32 %v4167_v0, %v1654_v21  ;;  %v1982_v38 = vadd.f32 %v1981_v36, %v1957_v59  ;;  %v2473_v40 = vand.u32 4294901760, %v2472_v37  ;;  %v2484_v0 = vsub.f32 %v4268_v26, %v2483_v39 }
 0x331   : > { %v2479_v7 = vand.u32 4294901760, %v2478_v60  ;;  %v1540_v36 = vadd.f32 %v4159_v51, %v1517_v49  ;;  %v1868_v8 = vadd.f32 %v4173_v57, %v1845_v45  ;;  %v2219_v12 = vsel %vm2218_vm11, %v2217_v43, %v4151_v48  ;;  %v2195_v17 = vpop.f32.mrf.mxu1  ;;  %v2615_v49 = vld [vmem:[%s4481_s3 + $0xb8] sm:$0xff]  ;;  %v2614_v45 = vld [vmem:[%s4481_s3 + $0xb0] sm:$0xff] }
 0x332   : > { %2474 = vmatpush.msra.mxu1 %v2473_v40  ;;  %v1704_v16 = vadd.f32 %v4165_v63, %v1681_v1  ;;  %v2485_v3 = vand.u32 4294901760, %v2484_v0  ;;  %v4345_v60 = vand.u32 4294901760, %v2615_v49  ;;  %vm3458_vm11 = vcmask 515568  }
 0x333   : > { %v2008_v25 = vpop.f32.mrf.mxu2  ;;  %v2145_v5 = vpop.f32.mrf.mxu3  ;;  %v2220_v54 = vrot.slane %v1540_v36, 5  ;;  %v2226_v63 = vrot.slane %v1868_v8, 3  ;;  %v4362_v36 = vand.u32 4294901760, %v2614_v45 }
 0x334   : > { %v2009_v46 = vadd.f32 %v2008_v25, %v1982_v38  ;;  %2480 = vmatpush.msra.mxu1 %v2479_v7  ;;  %v2223_v62 = vrot.slane %v1704_v16, 4  ;;  %v2679_v38 = vsub.f32 %v2615_v49, %v4345_v60  ;;  %v2613_v7 = vld [vmem:[%s4481_s3 + $0xa8] sm:$0xff]  ;;  %v2611_v16 = vld [vmem:[%s4481_s3 + $0x98] sm:$0xff] }
 0x335   : > { %v2222_v2 = vsel %vm2221_vm12, %v2220_v54, %v2219_v12  ;;  %v2849_v43 = vsub.f32 %v2614_v45, %v4362_v36  ;;  %vm3460_vm12 = vcmask 1048056  }
 0x336   : > { %v2032_v4 = vadd.f32 %v2031_v20, %v2009_v46  ;;  %2486 = vmatpush.msra.mxu1 %v2485_v3  ;;  %v2225_v59 = vsel %vm2224_vm13, %v2223_v62, %v2222_v2  ;;  %v4371_v3 = vand.u32 4294901760, %v2611_v16 }
 0x337   : > { %v2228_v20 = vsel %vm2227_vm14, %v2226_v63, %v2225_v59 }
 0x338   : > { %v2229_v57 = vrot.slane %v2032_v4, 2  ;;  %v4380_v54 = vsub.f32 %v2611_v16, %v4371_v3 }
 0x33a   : > { %v2231_v33 = vsel %vm2230_vm15, %v2229_v57, %v2228_v20 }
 0x33b   : > { %v2120_v22 = vpop.f32.mrf.mxu2 }
 0x33c   : > { %v2121_v61 = vadd.f32 %v2120_v22, %v2095_v55  ;;  %v4364_v55 = vand.u32 4294901760, %v2613_v7  ;;  %v4369_v22 = vand.u32 4294901760, %v2612_v41 }
 0x33e   : > { %v2146_v51 = vadd.f32 %v2145_v5, %v2121_v61  ;;  %v2855_v4 = vsub.f32 %v2613_v7, %v4364_v55  ;;  %v4376_v5 = vsub.f32 %v2612_v41, %v4369_v22  ;;  %v3631_v7 = vld [vmem:[%s4481_s3 + $0x119] ss:$0 sm:$0xff] }
 0x340   : > { %v2173_v10 = vadd.f32 %v2172_v9, %v2146_v51  ;;  %v2850_v9 = vand.u32 4294901760, %v2849_v43  ;;  %v2856_v63 = vand.u32 4294901760, %v2855_v4  ;;  %v2862_v12 = vand.u32 4294901760, %v4376_v5 }
 0x342   : > { %v2196_v11 = vadd.f32 %v2195_v17, %v2173_v10  ;;  %v2868_v17 = vand.u32 4294901760, %v4380_v54  ;;  %v2851_v2 = vsub.f32 %v2849_v43, %v2850_v9  ;;  %v2863_v20 = vsub.f32 %v4376_v5, %v2862_v12 }
 0x344   : > { %v2232_v25 = vrot.slane %v2196_v11, 1  ;;  %v2857_v11 = vsub.f32 %v2855_v4, %v2856_v63 }
 0x346   : > { %v2234_v24 = vsel %vm2233_vm0, %v2232_v25, %v2231_v33  ;;  %v2852_v25 = vand.u32 4294901760, %v2851_v2  ;;  %v2858_v33 = vand.u32 4294901760, %v2857_v11 }
 0x347   : > { %v2235_v28 = vsel %vm456_vm3, %v2234_v24, 0  ;;  %v2869_v24 = vsub.f32 %v4380_v54, %v2868_v17 }
 0x348   : > { %v2257_v21 = vand.u32 4294901760, %v2235_v28 }
 0x34a   : > { %2303 = vmatmul.f32.vlgmr.msra.gmra.mxu3 %v2257_v21  ;;  %v2258_v29 = vsub.f32 %v2235_v28, %v2257_v21  ;;  %v2864_v28 = vand.u32 4294901760, %v2863_v20 }
 0x34b   : > { %2535 = vmatpush.msra.mxu3 %v4220_v42 }
 0x34c   : > { %2333 = vmatmul.f32.vlgmr.msrb.gmra.mxu0 %v2258_v29  ;;  %v2259_v48 = vand.u32 4294901760, %v2258_v29 }
 0x34d   : > { %2537 = vmatpush.msra.mxu3 %v4234_v23  ;;  %2564 = vmatpush.msrb.mxu0 %v2465_v14 }
 0x34e   : > { %2360 = vmatmul.f32.vlgmr.msrb.gmra.mxu1 %v2259_v48  ;;  %v2260_v35 = vsub.f32 %v2258_v29, %v2259_v48 }
 0x34f   : > { %2539 = vmatpush.msra.mxu3 %v4236_v53  ;;  %2568 = vmatpush.msrb.mxu0 %v2471_v52 }
 0x350   : > { %v2261_v37 = vand.u32 4294901760, %v2260_v35  ;;  %2595 = vmatpush.msrb.mxu1 %v4220_v42  ;;  %v2618_v42 = vld [vmem:[%s4481_s3 + $0xd0] sm:$0xff]  ;;  %v2870_v35 = vand.u32 4294901760, %v2869_v24 }
 0x351   : > { %2541 = vmatpush.msra.mxu3 %v4257_v27  ;;  %2572 = vmatpush.msrb.mxu0 %v2477_v18 }
 0x352   : > { %2262 = vmatmul.f32.vlgmr.msra.gmra.mxu2 %v2261_v37  ;;  %2418 = vmatmul.f32.vlgmr.msrb.gmra.mxu3 %v2257_v21 }
 0x353   : > { %2597 = vmatpush.msrb.mxu1 %v4234_v23  ;;  %2506 = vmatpush.msra.mxu2 %v4232_v6  ;;  %v2617_v6 = vld [vmem:[%s4481_s3 + $0xc8] sm:$0xff] }
 0x354   : > { %2447 = vmatmul.f32.vlgmr.msra.gmra.mxu0 %v3871_v34  ;;  %v3649_v34 = vld [vmem:[#allocation3] sm:$0xff]  ;;  %v4327_v23 = vand.u32 4294901760, %v2617_v6 }
 0x355   : > { %2576 = vmatpush.msrb.mxu0 %v2483_v39  ;;  %2599 = vmatpush.msrb.mxu1 %v4236_v53  ;;  %v2680_v39 = vand.u32 4294901760, %v2679_v38 }
 0x356   : > { %2488 = vmatmul.f32.vlgmr.msra.gmra.mxu1 %v3858_v30  ;;  %2509 = vmatpush.msra.mxu2 %v4242_v15  ;;  %v2667_v53 = vsub.f32 %v2617_v6, %v4327_v23 }
 0x357   : > { %2601 = vmatpush.msrb.mxu1 %v4257_v27  ;;  %3218 = vrot.lane.b32.xlu2 %v3649_v34, %s3690_s23  ;;  %v2681_v0 = vsub.f32 %v2679_v38, %v2680_v39 }
 0x358   : > { %2512 = vmatpush.msra.mxu2 %v4251_v13  ;;  %v2668_v13 = vand.u32 4294901760, %v2667_v53 }
 0x359   : > { %v2682_v61 = vand.u32 4294901760, %v2681_v0 }
 0x35a   : > { %2393 = vmatmul.f32.vlgmr.msrb.gmra.mxu2 %v2257_v21  ;;  %2545 = vmatmul.f32.vlgmr.msra.gmra.mxu3 %v3866_v32  ;;  %v4325_v32 = vand.u32 4294901760, %v2618_v42  ;;  %v2669_v27 = vsub.f32 %v2667_v53, %v2668_v13 }
 0x35b   : > { %2515 = vmatpush.msra.mxu2 %v4268_v26 }
 0x35c   : > { %2578 = vmatmul.f32.vlgmr.msrb.gmra.mxu0 %v3858_v30  ;;  %2732 = vmatpush.msra.mxu1 %v4325_v32  ;;  %v2670_v26 = vand.u32 4294901760, %v2669_v27 }
 0x35d   : > { %2632 = vmatpush.msrb.mxu2 %v4325_v32 }
 0x35e   : > { %2603 = vmatmul.f32.vlgmr.msrb.gmra.mxu1 %v3858_v30  ;;  %v2616_v30 = vld [vmem:[%s4481_s3 + $0xc0] sm:$0xff] }
 0x35f   : > { %2634 = vmatpush.msrb.mxu2 %v4327_v23  ;;  %v4337_v15 = vand.u32 4294901760, %v2616_v30  ;;  %2734 = vmatpush.msra.mxu1 %v4327_v23 }
 0x361   : > { %2636 = vmatpush.msrb.mxu2 %v4337_v15  ;;  %2736 = vmatpush.msra.mxu1 %v4337_v15  ;;  %v2673_v1 = vsub.f32 %v2616_v30, %v4337_v15 }
 0x362   : > { %2518 = vmatmul.f32.vlgmr.msra.gmra.mxu2 %v3861_v31  ;;  %v2661_v31 = vsub.f32 %v2618_v42, %v4325_v32 }
 0x363   : > { %2638 = vmatpush.msrb.mxu2 %v4345_v60  ;;  %v2674_v19 = vand.u32 4294901760, %v2673_v1  ;;  %2738 = vmatpush.msra.mxu1 %v4345_v60 }
 0x364   : > { %v2662_v14 = vand.u32 4294901760, %v2661_v31  ;;  %2703 = vmatpush.msra.mxu0 %v2661_v31 }
 0x365   : > { %v2675_v40 = vsub.f32 %v2673_v1, %v2674_v19  ;;  %2853 = vmatpush.msrb.mxu1 %v2852_v25 }
 0x366   : > { %v2663_v52 = vsub.f32 %v2661_v31, %v2662_v14  ;;  %2706 = vmatpush.msra.mxu0 %v2667_v53  ;;  %2761 = vmatpush.msra.mxu2 %v2662_v14  ;;  %v3017_v31 = vld [vmem:[%s4481_s3 + $0xf0] sm:$0xff]  ;;  %v3016_v53 = vld [vmem:[%s4481_s3 + $0xe8] sm:$0xff]  ;;  %v3015_v14 = vld [vmem:[%s4481_s3 + $0xe0] sm:$0xff] }
 0x367   : > { %2742 = vmatmul.f32.vlgmr.msra.gmra.mxu1 %v3828_v50  ;;  %v2676_v46 = vand.u32 4294901760, %v2675_v40  ;;  %v3036_v27 = vand.u32 4294901760, %v3015_v14 }
 0x368   : > { %v2664_v18 = vand.u32 4294901760, %v2663_v52  ;;  %2709 = vmatpush.msra.mxu0 %v2673_v1  ;;  %2765 = vmatpush.msra.mxu2 %v2668_v13  ;;  %v3032_v13 = vand.u32 4294901760, %v3017_v31  ;;  %v3034_v52 = vand.u32 4294901760, %v3016_v53 }
 0x369   : > { %2859 = vmatpush.msrb.mxu1 %v2858_v33  ;;  %v3074_v40 = vsub.f32 %v3015_v14, %v3036_v27 }
 0x36a   : > { %2665 = vmatpush.msrb.mxu3 %v2664_v18  ;;  %2644 = vmatmul.f32.vlgmr.msrb.gmra.mxu2 %v3838_v58  ;;  %v3014_v18 = vld [vmem:[%s4481_s3 + $0xd8] sm:$0xff]  ;;  %v3062_v1 = vsub.f32 %v3017_v31, %v3032_v13 }
 0x36b   : > { %2712 = vmatpush.msra.mxu0 %v2679_v38  ;;  %2769 = vmatpush.msra.mxu2 %v2674_v19  ;;  %v3038_v49 = vand.u32 4294901760, %v3014_v18  ;;  %v3068_v19 = vsub.f32 %v3016_v53, %v3034_v52 }
 0x36c   : > { %2671 = vmatpush.msrb.mxu3 %v2670_v26  ;;  %2715 = vmatmul.f32.vlgmr.msra.gmra.mxu0 %v3825_v47  ;;  %v3063_v41 = vand.u32 4294901760, %v3062_v1 }
 0x36d   : > { %2773 = vmatpush.msra.mxu2 %v2680_v39  ;;  %2820 = vmatpush.msrb.mxu0 %v4362_v36  ;;  %v3080_v39 = vsub.f32 %v3014_v18, %v3038_v49 }
 0x36e   : > { %2677 = vmatpush.msrb.mxu3 %v2676_v46  ;;  %2865 = vmatpush.msrb.mxu1 %v2864_v28  ;;  %v3069_v46 = vand.u32 4294901760, %v3068_v19 }
 0x36f   : > { %2891 = vmatpush.msrb.mxu2 %v2849_v43  ;;  %2822 = vmatpush.msrb.mxu0 %v4364_v55 }
 0x370   : > { %2683 = vmatpush.msrb.mxu3 %v2682_v61  ;;  %2871 = vmatpush.msrb.mxu1 %v2870_v35 }
 0x371   : > { %2685 = vmatmul.f32.vlgmr.msrb.gmra.mxu3 %v3821_v44  ;;  %2894 = vmatpush.msrb.mxu2 %v2855_v4 }
 0x372   : > { %2775 = vmatmul.f32.vlgmr.msra.gmra.mxu2 %v3821_v44  ;;  %2792 = vmatpush.msra.mxu3 %v4325_v32 }
 0x373   : > { %2897 = vmatpush.msrb.mxu2 %v4376_v5  ;;  %2824 = vmatpush.msrb.mxu0 %v4369_v22 }
 0x374   : > { %2794 = vmatpush.msra.mxu3 %v4327_v23  ;;  %2980 = vmatpush.msra.mxu1 %v4362_v36 }
 0x375   : > { %2900 = vmatpush.msrb.mxu2 %v4380_v54  ;;  %2826 = vmatpush.msrb.mxu0 %v4371_v3 }
 0x376   : > { %2796 = vmatpush.msra.mxu3 %v4337_v15  ;;  %2982 = vmatpush.msra.mxu1 %v4364_v55 }
 0x377   : > { %2949 = vmatpush.msra.mxu0 %v2850_v9  ;;  %3033 = vmatpush.msra.mxu2 %v3032_v13 }
 0x378   : > { %2798 = vmatpush.msra.mxu3 %v4345_v60  ;;  %2984 = vmatpush.msra.mxu1 %v4369_v22 }
 0x379   : > { %2800 = vmatmul.f32.vlgmr.msra.gmra.mxu3 %v3821_v44  ;;  %2953 = vmatpush.msra.mxu0 %v2856_v63 }
 0x37a   : > { %2920 = vmatpush.msrb.mxu3 %v4362_v36  ;;  %2986 = vmatpush.msra.mxu1 %v4371_v3  ;;  %v3075_v36 = vand.u32 4294901760, %v3074_v40 }
 0x37b   : > { %2957 = vmatpush.msra.mxu0 %v2862_v12  ;;  %3035 = vmatpush.msra.mxu2 %v3034_v52 }
 0x37c   : > { %2922 = vmatpush.msrb.mxu3 %v4364_v55  ;;  %v3081_v55 = vand.u32 4294901760, %v3080_v39 }
 0x37d   : > { %2961 = vmatpush.msra.mxu0 %v2868_v17  ;;  %3037 = vmatpush.msra.mxu2 %v3036_v27 }
 0x37e   : > { %2924 = vmatpush.msrb.mxu3 %v4369_v22  ;;  %v3064_v22 = vsub.f32 %v3062_v1, %v3063_v41  ;;  %v3082_v5 = vsub.f32 %v3080_v39, %v3081_v55 }
 0x37f   : > { %3039 = vmatpush.msra.mxu2 %v3038_v49 }
 0x380   : > { %2926 = vmatpush.msrb.mxu3 %v4371_v3  ;;  %v3070_v3 = vsub.f32 %v3068_v19, %v3069_v46  ;;  %v3065_v43 = vand.u32 4294901760, %v3064_v22  ;;  %v3083_v9 = vand.u32 4294901760, %v3082_v5 }
 0x382   : > { %v3071_v4 = vand.u32 4294901760, %v3070_v3  ;;  %3066 = vmatpush.msra.mxu3 %v3065_v43 }
 0x384   : > { %3072 = vmatpush.msra.mxu3 %v3071_v4 }
 0x3c9   : > { %v2334_v51 = vpop.f32.mrf.mxu0 }
 0x3cb   : > { %v2361_v57 = vpop.f32.mrf.mxu1 }
 0x3cd   : > { %v2304_v8 = vpop.f32.mrf.mxu3 }
 0x3d1   : > { %v2448_v34 = vpop.f32.mrf.mxu0 }
 0x3d3   : > { %v2489_v6 = vpop.f32.mrf.mxu1 }
 0x3d5   : > { %v2263_v62 = vpop.f32.mrf.mxu2  ;;  %v2419_v29 = vpop.f32.mrf.mxu3 }
 0x3d6   : > { %v2305_v10 = vadd.f32 %v2304_v8, %v2263_v62  ;;  %v3076_v8 = vsub.f32 %v3074_v40, %v3075_v36 }
 0x3d8   : > { %v2335_v59 = vadd.f32 %v2334_v51, %v2305_v10  ;;  %v3077_v51 = vand.u32 4294901760, %v3076_v8 }
 0x3d9   : > { %v2579_v38 = vpop.f32.mrf.mxu0 }
 0x3da   : > { %v2362_v21 = vadd.f32 %v2361_v57, %v2335_v59  ;;  %3078 = vmatpush.msra.mxu3 %v3077_v51  ;;  %v3226_v51 = vld [vmem:[%s4481_s3 + $0x110] sm:$0xff] }
 0x3db   : > { %v2604_v0 = vpop.f32.mrf.mxu1 }
 0x3dc   : > { %3084 = vmatpush.msra.mxu3 %v3083_v9  ;;  %v3246_v9 = vand.u32 4294901760, %v3226_v51 }
 0x3dd   : > { %v2394_v48 = vpop.f32.mrf.mxu2  ;;  %v2546_v26 = vpop.f32.mrf.mxu3 }
 0x3de   : > { %v2395_v37 = vadd.f32 %v2394_v48, %v2362_v21 }
 0x3e0   : > { %v2420_v42 = vadd.f32 %v2419_v29, %v2395_v37 }
 0x3e2   : > { %v2449_v32 = vadd.f32 %v2448_v34, %v2420_v42 }
 0x3e4   : > { %v2490_v23 = vadd.f32 %v2489_v6, %v2449_v32  ;;  %v2743_v25 = vpop.f32.mrf.mxu1 }
 0x3e5   : > { %v2519_v30 = vpop.f32.mrf.mxu2 }
 0x3e6   : > { %v2520_v15 = vadd.f32 %v2519_v30, %v2490_v23  ;;  %v3632_v23 = vld [vmem:[%s4481_s3 + $0x11a] ss:$0 sm:$0xff] }
 0x3e8   : > { %v2547_v60 = vadd.f32 %v2546_v26, %v2520_v15  ;;  %v3633_v15 = vld [vmem:[%s4481_s3 + $0x11b] ss:$0 sm:$0xff] }
 0x3e9   : > { %v2716_v59 = vpop.f32.mrf.mxu0 }
 0x3ea   : > { %v2580_v45 = vadd.f32 %v2579_v38, %v2547_v60 }
 0x3ec   : > { %v2605_v16 = vadd.f32 %v2604_v0, %v2580_v45 }
 0x3ed   : > { %v2645_v2 = vpop.f32.mrf.mxu2 }
 0x3ee   : > { %v2609_v61 = vadd.f32 %v3631_v7, %v2605_v16 }
 0x3f0   : > { %v2610_v54 = vmax.f32 %v2609_v61, 0.0 }
 0x3f2   : > { %v2805_v62 = vsel %vm456_vm3, %v2610_v54, 0 }
 0x3f3   : > { %v2827_v63 = vand.u32 4294901760, %v2805_v62 }
 0x3f4   : > { %v2686_v11 = vpop.f32.mrf.mxu3 }
 0x3f5   : > { %2873 = vmatmul.f32.vlgmr.msrb.gmra.mxu1 %v2827_v63  ;;  %v2828_v10 = vsub.f32 %v2805_v62, %v2827_v63  ;;  %v2776_v24 = vpop.f32.mrf.mxu2  ;;  %v3225_v62 = vld [vmem:[%s4481_s3 + $0x108] sm:$0xff] }
 0x3f6   : > { %3133 = vmatpush.msrb.mxu1 %v3032_v13 }
 0x3f7   : > { %2903 = vmatmul.f32.vlgmr.msrb.gmra.mxu2 %v2828_v10  ;;  %v2829_v12 = vand.u32 4294901760, %v2828_v10 }
 0x3f8   : > { %3162 = vmatpush.msrb.mxu2 %v3063_v41  ;;  %3135 = vmatpush.msrb.mxu1 %v3034_v52 }
 0x3f9   : > { %2930 = vmatmul.f32.vlgmr.msrb.gmra.mxu3 %v2829_v12  ;;  %v2830_v17 = vsub.f32 %v2828_v10, %v2829_v12  ;;  %v3276_v10 = vsub.f32 %v3226_v51, %v3246_v9 }
 0x3fa   : > { %3166 = vmatpush.msrb.mxu2 %v3069_v46  ;;  %3193 = vmatpush.msrb.mxu3 %v3032_v13 }
 0x3fb   : > { %v2831_v57 = vand.u32 4294901760, %v2830_v17  ;;  %3137 = vmatpush.msrb.mxu1 %v3036_v27  ;;  %v3277_v17 = vand.u32 4294901760, %v3276_v10 }
 0x3fc   : > { %3170 = vmatpush.msrb.mxu2 %v3075_v36  ;;  %3195 = vmatpush.msrb.mxu3 %v3034_v52  ;;  %v2801_v21 = vpop.f32.mrf.mxu3 }
 0x3fd   : > { %2832 = vmatmul.f32.vlgmr.msrb.gmra.mxu0 %v2831_v57  ;;  %2988 = vmatmul.f32.vlgmr.msra.gmra.mxu1 %v2827_v63 }
 0x3fe   : > { %3104 = vmatpush.msrb.mxu0 %v3062_v1  ;;  %3174 = vmatpush.msrb.mxu2 %v3081_v55 }
 0x3ff   : > { %3045 = vmatmul.f32.vlgmr.msra.gmra.mxu2 %v3838_v58  ;;  %3197 = vmatpush.msrb.mxu3 %v3036_v27  ;;  %v2687_v58 = vadd.f32 %v2686_v11, %v2645_v2  ;;  %v3278_v2 = vsub.f32 %v3276_v10, %v3277_v17 }
 0x400   : > { %3107 = vmatpush.msrb.mxu0 %v3068_v19  ;;  %3139 = vmatpush.msrb.mxu1 %v3038_v49 }
 0x401   : > { %3086 = vmatmul.f32.vlgmr.msra.gmra.mxu3 %v3821_v44  ;;  %v2717_v20 = vadd.f32 %v2716_v59, %v2687_v58  ;;  %3318 = vmatpush.msra.mxu2 %v3276_v10  ;;  %v3279_v58 = vand.u32 4294901760, %v3278_v2 }
 0x402   : > { %3110 = vmatpush.msrb.mxu0 %v3074_v40  ;;  %3199 = vmatpush.msrb.mxu3 %v3038_v49 }
 0x403   : > { %v2744_v33 = vadd.f32 %v2743_v25, %v2717_v20  ;;  %3280 = vmatpush.msra.mxu1 %v3279_v58  ;;  %v3219_v20 = vpop.permute.xlu2 %3218 }
 0x404   : > { %3113 = vmatpush.msrb.mxu0 %v3080_v39  ;;  %3347 = vmatpush.msra.mxu3 %v3246_v9 }
 0x405   : > { %2963 = vmatmul.f32.vlgmr.msra.gmra.mxu0 %v2827_v63  ;;  %3143 = vmatmul.f32.vlgmr.msrb.gmra.mxu1 %v3828_v50  ;;  %v2777_v28 = vadd.f32 %v2776_v24, %v2744_v33  ;;  %v3248_v63 = vand.u32 4294901760, %v3225_v62 }
 0x406   : > { %3247 = vmatpush.msra.mxu0 %v3246_v9 }
 0x407   : > { %3176 = vmatmul.f32.vlgmr.msrb.gmra.mxu2 %v3821_v44  ;;  %v2802_v29 = vadd.f32 %v2801_v21, %v2777_v28  ;;  %v3282_v12 = vsub.f32 %v3225_v62, %v3248_v63  ;;  %3349 = vmatpush.msra.mxu3 %v3248_v63 }
 0x408   : > { %3249 = vmatpush.msra.mxu0 %v3248_v63 }
 0x409   : > { %3201 = vmatmul.f32.vlgmr.msrb.gmra.mxu3 %v3821_v44  ;;  %v3283_v57 = vand.u32 4294901760, %v3282_v12  ;;  %3321 = vmatpush.msra.mxu2 %v3282_v12 }
 0x40b   : > { %v3284_v11 = vsub.f32 %v3282_v12, %v3283_v57 }
 0x40d   : > { %3116 = vmatmul.f32.vlgmr.msrb.gmra.mxu0 %v3825_v47  ;;  %v3285_v59 = vand.u32 4294901760, %v3284_v11 }
 0x40f   : > { %3286 = vmatpush.msra.mxu1 %v3285_v59 }
 0x472   : > { %v2874_v48 = vpop.f32.mrf.mxu1 }
 0x47a   : > { %v2833_v35 = vpop.f32.mrf.mxu0  ;;  %v2904_v34 = vpop.f32.mrf.mxu2 }
 0x47b   : > { %v2834_v50 = vadd.f32 %v2833_v35, %v2802_v29  ;;  %v2989_v30 = vpop.f32.mrf.mxu1  ;;  %v3224_v29 = vld [vmem:[%s4481_s3 + $0x100] sm:$0xff]  ;;  %v3223_v35 = vld [vmem:[%s4481_s3 + $0xf8] sm:$0xff] }
 0x47c   : > { %v2931_v44 = vpop.f32.mrf.mxu3 }
 0x47d   : > { %v2875_v37 = vadd.f32 %v2874_v48, %v2834_v50  ;;  %v3250_v48 = vand.u32 4294901760, %v3224_v29 }
 0x47f   : > { %v2905_v42 = vadd.f32 %v2904_v34, %v2875_v37  ;;  %v3288_v50 = vsub.f32 %v3224_v29, %v3250_v48  ;;  %v3252_v37 = vand.u32 4294901760, %v3223_v35  ;;  %3351 = vmatpush.msra.mxu3 %v3250_v48  ;;  %3251 = vmatpush.msra.mxu0 %v3250_v48 }
 0x481   : > { %v2932_v6 = vadd.f32 %v2931_v44, %v2905_v42  ;;  %v3289_v34 = vand.u32 4294901760, %v3288_v50  ;;  %v3294_v42 = vsub.f32 %v3223_v35, %v3252_v37  ;;  %3324 = vmatpush.msra.mxu2 %v3288_v50  ;;  %3353 = vmatpush.msra.mxu3 %v3252_v37 }
 0x482   : > { %v2964_v47 = vpop.f32.mrf.mxu0  ;;  %v3046_v13 = vpop.f32.mrf.mxu2  ;;  %3253 = vmatpush.msra.mxu0 %v3252_v37 }
 0x483   : > { %v2965_v32 = vadd.f32 %v2964_v47, %v2932_v6  ;;  %v3047_v52 = vadd.f32 %v3633_v15, %v3046_v13  ;;  %v3144_v19 = vpop.f32.mrf.mxu1  ;;  %v3290_v44 = vsub.f32 %v3288_v50, %v3289_v34  ;;  %v3295_v6 = vand.u32 4294901760, %v3294_v42  ;;  %3327 = vmatpush.msra.mxu2 %v3294_v42 }
 0x484   : > { %v3087_v27 = vpop.f32.mrf.mxu3  ;;  %3376 = vmatpush.msrb.mxu0 %v3277_v17 }
 0x485   : > { %v2990_v31 = vadd.f32 %v2989_v30, %v2965_v32  ;;  %v3088_v26 = vadd.f32 %v3087_v27, %v3047_v52  ;;  %v3291_v47 = vand.u32 4294901760, %v3290_v44  ;;  %v3296_v32 = vsub.f32 %v3294_v42, %v3295_v6  ;;  %v3634_v27 = vld [vmem:[%s4481_s3 + $0x11c] ss:$0 sm:$0xff] }
 0x486   : > { %3380 = vmatpush.msrb.mxu0 %v3283_v57 }
 0x487   : > { %v2994_v53 = vadd.f32 %v3632_v23, %v2990_v31  ;;  %3292 = vmatpush.msra.mxu1 %v3291_v47  ;;  %v3297_v23 = vand.u32 4294901760, %v3296_v32 }
 0x488   : > { %3384 = vmatpush.msrb.mxu0 %v3289_v34 }
 0x489   : > { %v3579_v14 = vmul.f32 -1.442695, %v2994_v53  ;;  %3298 = vmatpush.msra.mxu1 %v3297_v23 }
 0x48a   : > { %v3117_v60 = vpop.f32.mrf.mxu0  ;;  %v3177_v39 = vpop.f32.mrf.mxu2  ;;  %3388 = vmatpush.msrb.mxu0 %v3295_v6 }
 0x48b   : > { %3639 = vpow2.f32 %v3579_v14  ;;  %v3118_v1 = vadd.f32 %v3117_v60, %v3088_v26  ;;  %3407 = vmatpush.msrb.mxu1 %v3246_v9 }
 0x48c   : > { %v3202_v46 = vpop.f32.mrf.mxu3 }
 0x48d   : > { %v3145_v38 = vadd.f32 %v3144_v19, %v3118_v1  ;;  %3409 = vmatpush.msrb.mxu1 %v3248_v63 }
 0x48f   : > { %v3178_v7 = vadd.f32 %v3177_v39, %v3145_v38  ;;  %3411 = vmatpush.msrb.mxu1 %v3250_v48 }
 0x491   : > { %v3640_v18 = vpop.eup %3639  ;;  %v3203_v16 = vadd.f32 %v3202_v46, %v3178_v7  ;;  %3413 = vmatpush.msrb.mxu1 %v3252_v37 }
 0x492   : > { %v2998_v49 = vadd.f32 1.0, %v3640_v18 }
 0x494   : > { %3641 = vrcp.f32 %v2998_v49  ;;  %v3010_v0 = vand.u32 2147483648, %v2998_v49  ;;  %v3008_v55 = vand.u32 2147483647, %v2998_v49  ;;  %vm3004_vm4 = vweird.f32 %v2998_v49 }
 0x496   : > { %v3011_v3 = vor.u32 1.1754944e-38, %v3010_v0  ;;  %vm3009_vm6 = vcmp.eq.f32.partialorder %v3008_v55, 8.507059e+37  ;;  %v3433_v0 = vlaneseq }
 0x49a   : > { %v3642_v40 = vpop.eup %3641 }
 0x49b   : > { %v3000_v45 = vmul.f32 %v3642_v40, %v2998_v49  ;;  %vm3005_vm1 = vweird.f32 %v3642_v40 }
 0x49c   : > { %vm3006_vm5 = vmor %vm3004_vm4, %vm3005_vm1 }
 0x49d   : > { %v3001_v41 = vsub.f32 1.0, %v3000_v45 }
 0x49f   : > { %v3002_v36 = vmul.f32 %v3642_v40, %v3001_v41 }
 0x4a1   : > { %v3003_v22 = vadd.f32 %v3642_v40, %v3002_v36  ;;  %v3434_v36 = vand.u32 127, %v3433_v0 }
 0x4a3   : > { %v3007_v8 = vsel %vm3006_vm5, %v3642_v40, %v3003_v22  ;;  %v3435_v55 = vcvt.s32.f32 %v3434_v36 }
 0x4a4   : > { %v3012_v61 = vsel %vm3009_vm6, %v3011_v3, %v3007_v8 }
 0x4a5   : > { %v3205_v43 = vmul.f32 %v3203_v16, %v3012_v61  ;;  %v3212_v25 = vsub.f32 1.0, %v3012_v61  ;;  %v3221_v24 = vmul.f32 %v3219_v20, %v3012_v61 }
 0x4a7   : > { %3207 = vrot.lane.b32.xlu1 %v3205_v43, %s3691_s5 }
 0x519   : > { %v3208_v4 = vpop.permute.xlu1 %3207 }
 0x51a   : > { %v3210_v5 = vadd.f32 %v3208_v4, %v2994_v53 }
 0x51c   : > { %3643 = vtanh.f32 %v3210_v5 }
 0x522   : > { %v3644_v54 = vpop.eup %3643 }
 0x523   : > { %3214 = vrot.lane.b32.xlu1 %v3644_v54, %s3692_s6 }
 0x595   : > { %v3215_v33 = vpop.permute.xlu1 %3214 }
 0x596   : > { %v3217_v28 = vmul.f32 %v3215_v33, %v3212_v25 }
 0x598   : > { %v3222_v21 = vadd.f32 %v3221_v24, %v3217_v28 }
 0x59a   : > { %3230 = vrot.lane.b32.xlu2 %v3222_v21, %s3692_s6 }
 0x5f4   : > { %v3231_v30 = vpop.permute.xlu2 %3230 }
 0x5f5   : > { %v3232_v31 = vsel %vm456_vm3, %v3231_v30, 0  ;;  %3445 = vst.msk [vmem:[#allocation3] sm:$0xff] %vm456_vm3, %v3231_v30  ;;  %vm3419_vm3 = vcmask 162816  }
 0x5f6   : > { %v3254_v53 = vand.u32 4294901760, %v3232_v31 }
 0x5f8   : > { %v3255_v14 = vsub.f32 %v3232_v31, %v3254_v53  ;;  %3300 = vmatmul.f32.vlgmr.msra.gmra.mxu1 %v3254_v53 }
 0x5fa   : > { %v3256_v15 = vand.u32 4294901760, %v3255_v14  ;;  %3330 = vmatmul.f32.vlgmr.msra.gmra.mxu2 %v3255_v14 }
 0x5fc   : > { %v3257_v13 = vsub.f32 %v3255_v14, %v3256_v15  ;;  %3357 = vmatmul.f32.vlgmr.msra.gmra.mxu3 %v3256_v15 }
 0x5fe   : > { %v3258_v52 = vand.u32 4294901760, %v3257_v13 }
 0x600   : > { %3259 = vmatmul.f32.vlgmr.msra.gmra.mxu0 %v3258_v52  ;;  %3415 = vmatmul.f32.vlgmr.msrb.gmra.mxu1 %v3254_v53 }
 0x608   : > { %3390 = vmatmul.f32.vlgmr.msrb.gmra.mxu0 %v3254_v53 }
 0x675   : > { %v3301_v18 = vpop.f32.mrf.mxu1 }
 0x67d   : > { %v3260_v26 = vpop.f32.mrf.mxu0  ;;  %v3331_v1 = vpop.f32.mrf.mxu2 }
 0x67e   : > { %v3261_v49 = vadd.f32 %v3634_v27, %v3260_v26  ;;  %v3416_v7 = vpop.f32.mrf.mxu1 }
 0x67f   : > { %v3358_v38 = vpop.f32.mrf.mxu3 }
 0x680   : > { %v3302_v60 = vadd.f32 %v3301_v18, %v3261_v49 }
 0x682   : > { %v3332_v19 = vadd.f32 %v3331_v1, %v3302_v60 }
 0x684   : > { %v3359_v40 = vadd.f32 %v3358_v38, %v3332_v19 }
 0x685   : > { %v3391_v39 = vpop.f32.mrf.mxu0 }
 0x686   : > { %v3392_v45 = vadd.f32 %v3391_v39, %v3359_v40 }
 0x688   : > { %v3417_v41 = vadd.f32 %v3416_v7, %v3392_v45 }
 0x68a   : > { %v3420_v46 = vsel %vm3419_vm3, %v3417_v41, -inf }
 0x68b   : > { %3421 = vmax.xlane.f32.xlu0 %v3420_v46 }
 0x69f   : > { %3448 = vrot.lane.b32.xlu0 %v3222_v21, %s3693_s25 }
 0x6a7   : > { %3453 = vrot.lane.b32.xlu0 %v3917_v56, %s3694_s7  ;;  %v3695_v56 = vmov 0.0  }
 0x6fe   : > { %v3422_v16 = vpop.xlane.xlu0 %3421 }
 0x6ff   : > { %v3423_v22 = vsub.f32 %v3417_v41, %v3422_v16  ;;  %vm3436_vm7 = vcmp.eq.f32.partialorder %v3417_v41, %v3422_v16 }
 0x700   : > { %v3437_v3 = vsel %vm3436_vm7, %v3435_v55, 20.0 }
 0x701   : > { %v3424_v8 = vmul.f32 1.442695, %v3423_v22  ;;  %v3438_v61 = vsel %vm3419_vm3, %v3437_v3, inf }
 0x702   : > { %3439 = vmin.xlane.f32.xlu2 %v3438_v61 }
 0x703   : > { %3645 = vpow2.f32 %v3424_v8 }
 0x709   : > { %v3646_v43 = vpop.eup %3645 }
 0x70a   : > { %v3426_v4 = vsel %vm3419_vm3, %v3646_v43, 0.0 }
 0x70b   : > { %3427 = vadd.xlane.f32.xlu1 %v3426_v4 }
 0x711   : > { %v3449_v62 = vpop.permute.xlu0 %3448 }
 0x719   : > { %v3454_v17 = vpop.permute.xlu0 %3453 }
 0x775   : > { %v3440_v5 = vpop.xlane.xlu2 %3439 }
 0x776   : > { %vm3441_vm8 = vcmp.eq.f32.partialorder %v3435_v55, %v3440_v5 }
 0x777   : > { %v3580_v54 = vsel %vm3441_vm8, 1.0, %v3695_v56 }
 0x778   : > { %3446 = vst.msk [vmem:[#allocation2] sm:$0xff] %vm272_vm2, %v3580_v54 }
 0x77e   : > { %v3428_v51 = vpop.xlane.xlu1 %3427 }
 0x77f   : > { %3647 = vlog2.f32 %v3428_v51 }
 0x785   : > { %v3648_v9 = vpop.eup %3647 }
 0x786   : > { %v3430_v63 = vmul.f32 0.6931472, %v3648_v9 }
 0x788   : > { %v3431_v10 = vadd.f32 %v3430_v63, %v3422_v16 }
 0x78a   : > { %v3432_v12 = vsub.f32 %v3417_v41, %v3431_v10 }
 0x78c   : > { %3447 = vst.msk [vmem:[%s3769_s14] sm:$0xff] %vm3419_vm3, %v3432_v12 }
 0x78d   : > { %3452 = vst.msk [vmem:[%s3769_s14] sm:$0xff] %vm3451_vm9, %v3449_v62 }
 0x78e   : > { %3457 = vst.msk [vmem:[%s3769_s14] sm:$0xff] %vm3456_vm10, %v3454_v17 }
 0x78f   : > { %3459 = vst.msk [vmem:[%s3769_s14] sm:$0xff] %vm3458_vm11, %v3440_v5 }
 0x790   : > { %3461 = vst.msk [vmem:[%s3769_s14] sm:$0xff] %vm3460_vm12, %v3695_v56 }
 0x791 PF: > { %s14_s19 = sadd.s32 1, %s3688_s19   ;;  %s4483_s15 = smov %s3680_s17 }
 0x792   : > { %p11_p9 = scmp.ge.s32.totalorder %s14_s19, 22   ;;  %s4484_s16 = smov %s3684_s18 }
 0x793   : > { %s4485_s17 = smov %s4488_s20  ;;  %s4486_s18 = smov %s4492_s21 }
 0x794   :  { %13 = sbr.rel (!%p11_p9) target bundleno = 3 (0x3), region = 76 }

</bundles_post_ra>
